<compile_context>
chip_gen: v7x
topology: tpu7x:2x2x1
jax: 0.10.0
libtpu: 0.0.40
codegen_flags: <defaults>
</compile_context>

<pallas_src>
import functools

import jax
import jax.numpy as jnp
from jax.experimental import pallas as pl
from jax.experimental.pallas import tpu as pltpu

# ---- model hyper-params (mirrors CustomBert2ConvModel.__init__) -------------
NUM_BERT_LAYERS = 12                      # bert-base num_hidden_layers
HIDDEN = 768                              # bert-base hidden size (== conv kernel width)
OUT_CHANNEL = 16                          # per-group output channels of `conv`
C = NUM_BERT_LAYERS * OUT_CHANNEL         # 192 == self.out_channels
CNN1_KS = 3                               # conv kernel height
CONV1_OUT = 192                           # nn.Conv2d(..., out_channels=192, ...)
OC1 = CONV1_OUT // NUM_BERT_LAYERS        # 16 in/out channels per group in conv1
N_CLASS = 4
LANE = 128                                # logits padded to a lane-dense width


def init_params(key):
    """Deterministic synthetic parameters (PyTorch-default-style uniform init)."""
    ks = jax.random.split(key, 6)

    def u(k, shape, fan_in):
        bound = 1.0 / float(fan_in) ** 0.5
        return jax.random.uniform(k, shape, jnp.float32, -bound, bound)

    fan1 = 1 * CNN1_KS * HIDDEN           # conv:  (in_ch/groups) * kH * kW
    fan2 = OC1 * 3 * 3                    # conv1: (in_ch/groups) * kH * kW
    return dict(
        w_conv=u(ks[0], (C, 1, CNN1_KS, HIDDEN), fan1),      # OIHW
        b_conv=u(ks[1], (C,), fan1),
        w_conv1=u(ks[2], (CONV1_OUT, OC1, 3, 3), fan2),       # OIHW
        b_conv1=u(ks[3], (CONV1_OUT,), fan2),
        w_fc=u(ks[4], (N_CLASS, C), C),
        b_fc=u(ks[5], (N_CLASS,), C),
    )


def prepare_params(params):
    """One-time weight preprocessing (hoisted out of the jitted forward)."""
    # conv -> per-tap (H, C) matmul matrices: w1[k, d, c] = W[c, 0, k, d].
    w1 = jnp.transpose(params['w_conv'][:, 0], (1, 2, 0)).astype(jnp.bfloat16)
    b1 = params['b_conv'][None, :].astype(jnp.float32)

    # conv1: output width is 1 (the width padding only hits the outer kernel
    # columns), so only the centre width-column is live; expand the group
    # structure into a block-diagonal (C, C) matrix per height tap.
    w2c = params['w_conv1'][:, :, :, 1]                       # (C, OC1, 3)
    w2 = jnp.zeros((3, C, C), jnp.float32)
    for g in range(NUM_BERT_LAYERS):
        blk = jnp.transpose(w2c[g * OC1:(g + 1) * OC1], (2, 1, 0))   # (3, in, out)
        w2 = w2.at[:, g * OC1:(g + 1) * OC1, g * OC1:(g + 1) * OC1].set(blk)
    w2 = w2.astype(jnp.bfloat16)
    b2 = params['b_conv1'][None, :].astype(jnp.float32)

    # fc head, zero-padded to 128 lanes so the kernel's final store is unmasked.
    w3 = jnp.zeros((C, LANE), jnp.float32).at[:, :N_CLASS].set(params['w_fc'].T)
    b3 = jnp.zeros((1, LANE), jnp.float32).at[:, :N_CLASS].set(params['b_fc'][None, :])
    return dict(w1=w1, b1=b1, w2=w2, b2=b2, w3=w3, b3=b3)


def _kernel(h_ref, w1_ref, b1_ref, w2_ref, b2_ref, w3_ref, b3_ref, out_ref, *, ks):
    tb, S, H = h_ref.shape
    L = S - ks + 1
    rows = tb * S
    Cc = w2_ref.shape[1]

    # Fold the batch tile into the MXU M dimension: (TB, S, H) -> (TB*S, H).
    h2 = h_ref[...].reshape(rows, H)

    # Rows s in [L, S) of each length-S slab are not real conv outputs; they are
    # zeroed below and double as conv1's height zero-padding.
    sidx = jax.lax.broadcasted_iota(jnp.int32, (tb, S, Cc), 1)
    keep = sidx < L

    # --- conv: grouped Conv2d(12 -> 192, (ks, 768)) on 12 identical copies.
    #     One (TB*S, H) @ (H, C) bf16 MXU matmul per tap (f32 accumulation);
    #     taps combine with upward rolls (row r pulls rows r+1, ..., r+ks-1).
    z = jnp.zeros((rows, Cc), jnp.float32)
    for k in range(ks):
        yk = jnp.dot(h2, w1_ref[k], preferred_element_type=jnp.float32)
        z = z + (yk if k == 0 else pltpu.roll(yk, rows - k, axis=0))
    acc1 = jnp.where(keep, (z + b1_ref[...]).reshape(tb, S, Cc), 0.0)
    acc1 = acc1.reshape(rows, Cc)

    # --- conv1: grouped Conv2d(192 -> 192, (3, 3), padding=1, groups=12).
    #     Width dim is 1, so only the centre kernel column multiplies real data.
    #     Height padding (=1) is supplied by the zeroed rows above; taps combine
    #     with +/-1-row rolls instead of a padded VMEM scratch.
    a_bf = acc1.astype(w2_ref.dtype)
    v0 = jnp.dot(a_bf, w2_ref[0], preferred_element_type=jnp.float32)
    v1 = jnp.dot(a_bf, w2_ref[1], preferred_element_type=jnp.float32)
    v2 = jnp.dot(a_bf, w2_ref[2], preferred_element_type=jnp.float32)
    acc2 = pltpu.roll(v0, 1, axis=0) + v1 + pltpu.roll(v2, rows - 1, axis=0)
    acc2 = acc2 + b2_ref[...]

    # --- squeeze + max over valid sequence positions, then the linear head.
    acc2 = jnp.where(keep, acc2.reshape(tb, S, Cc), -1e30)
    m = jnp.max(acc2, axis=1)                                 # (TB, C)
    out_ref[...] = (jnp.dot(m, w3_ref[...], preferred_element_type=jnp.float32)
                    + b3_ref[...])                            # (TB, 128) lane-dense


def _pick_batch_tile(B, S):
    """Batch elements per grid step; target ~256 M-rows per MXU matmul."""
    target = max(1, 256 // max(S, 1))
    if B <= target:
        return B
    # keep output blocks sublane-aligned when the grid has multiple steps
    return max(8, (min(target, B) // 8) * 8)


@jax.jit
def bert2conv_forward(hidden, prepped):
    B, S, H = hidden.shape
    ks = CNN1_KS
    tb = _pick_batch_tile(B, S)
    b_pad = -(-B // tb) * tb
    if b_pad != B:
        hidden = jnp.pad(hidden, ((0, b_pad - B), (0, 0), (0, 0)))
    hidden = hidden.astype(jnp.bfloat16)      # halves hidden-state DMA; bf16-native MXU

    cost = pl.CostEstimate(
        flops=2 * b_pad * S * (ks * H * C + 3 * C * C) + 2 * b_pad * C * LANE,
        transcendentals=0,
        bytes_accessed=(b_pad * S * H * 2 + ks * H * C * 2 + 3 * C * C * 2
                        + 2 * C * 4 + (C + 1) * LANE * 4 + b_pad * LANE * 4),
    )
    out = pl.pallas_call(
        functools.partial(_kernel, ks=ks),
        out_shape=jax.ShapeDtypeStruct((b_pad, LANE), jnp.float32),
        grid_spec=pltpu.PrefetchScalarGridSpec(
            num_scalar_prefetch=0,
            grid=(b_pad // tb,),
            in_specs=[
                pl.BlockSpec((tb, S, H), lambda i: (i, 0, 0)),    # hidden (batch tile)
                pl.BlockSpec((ks, H, C), lambda i: (0, 0, 0)),    # w1 per-tap matrices
                pl.BlockSpec((1, C), lambda i: (0, 0)),           # b1
                pl.BlockSpec((3, C, C), lambda i: (0, 0, 0)),     # w2 block-diag taps
                pl.BlockSpec((1, C), lambda i: (0, 0)),           # b2
                pl.BlockSpec((C, LANE), lambda i: (0, 0)),        # w3 (lane padded)
                pl.BlockSpec((1, LANE), lambda i: (0, 0)),        # b3
            ],
            out_specs=pl.BlockSpec((tb, LANE), lambda i: (i, 0)),
        ),
        compiler_params=pltpu.CompilerParams(
            dimension_semantics=("parallel",)),   # per-tile output blocks -> megacore-safe
        cost_estimate=cost,
    )(hidden, prepped['w1'], prepped['b1'], prepped['w2'], prepped['b2'],
      prepped['w3'], prepped['b3'])
    return out[:B, :N_CLASS]


def reference_forward(hidden, params):
    """Pure-JAX reference replicating the PyTorch (NCHW) conv path exactly."""
    B, S, H = hidden.shape
    x = jnp.broadcast_to(hidden[:, None, :, :], (B, NUM_BERT_LAYERS, S, H))
    y = jax.lax.conv_general_dilated(
        x, params['w_conv'], window_strides=(1, 1), padding='VALID',
        dimension_numbers=('NCHW', 'OIHW', 'NCHW'),
        feature_group_count=NUM_BERT_LAYERS,
        precision=jax.lax.Precision.HIGHEST)
    y = y + params['b_conv'][None, :, None, None]
    y = jax.lax.conv_general_dilated(
        y, params['w_conv1'], window_strides=(1, 1), padding=((1, 1), (1, 1)),
        dimension_numbers=('NCHW', 'OIHW', 'NCHW'),
        feature_group_count=NUM_BERT_LAYERS,
        precision=jax.lax.Precision.HIGHEST)
    y = y + params['b_conv1'][None, :, None, None]
    y = jnp.squeeze(y, axis=3)                                # (B, 192, L)
    m = jnp.max(y, axis=2)                                    # (B, 192)
    return m @ params['w_fc'].T + params['b_fc']


if __name__ == "__main__":
    key = jax.random.PRNGKey(0)
    pkey, hkey = jax.random.split(key)
    params = init_params(pkey)
    prepped = prepare_params(params)

    B, S = 2, 16
    # TODO(synk): the BertTokenizer tokenization of `sents` and the pretrained BertModel
    # encoder have no Pallas equivalent; we synthesize the selected BERT hidden layer
    # (what `encoded_layers[2][BERT_layer_value]` would return) directly.
    hidden = jax.random.normal(hkey, (B, S, HIDDEN), jnp.float32)

    out = bert2conv_forward(hidden, prepped)
    out = jax.block_until_ready(out)

    ref = reference_forward(hidden, params)
    assert out.shape == (B, N_CLASS)
    assert jnp.allclose(out, ref, rtol=1e-2, atol=1e-2)
    print("KERNEL_OK")
</pallas_src>

<mosaic_0001>
module attributes {stable_mosaic.version = 11 : i64} {
  func.func @_kernel(%arg0: i32, %arg1: memref<2x16x768xbf16, #tpu.memory_space<vmem>>, %arg2: memref<3x768x192xbf16, #tpu.memory_space<vmem>>, %arg3: memref<1x192xf32, #tpu.memory_space<vmem>>, %arg4: memref<3x192x192xbf16, #tpu.memory_space<vmem>>, %arg5: memref<1x192xf32, #tpu.memory_space<vmem>>, %arg6: memref<192x128xf32, #tpu.memory_space<vmem>>, %arg7: memref<1x128xf32, #tpu.memory_space<vmem>>, %arg8: memref<2x128xf32, #tpu.memory_space<vmem>>) attributes {dimension_semantics = [#tpu.dimension_semantics<parallel>], iteration_bounds = array<i64: 1>, scalar_prefetch = 0 : i64, scratch_operands = 0 : i64, tpu.core_type = #tpu.core_type<tc>, window_params = [{transform_indices = @transform_0, window_bounds = array<i64: 2, 16, 768>}, {pipeline_mode = #tpu.pipeline_mode<synchronous>, transform_indices = @transform_1, window_bounds = array<i64: 3, 768, 192>}, {pipeline_mode = #tpu.pipeline_mode<synchronous>, transform_indices = @transform_2, window_bounds = array<i64: 1, 192>}, {pipeline_mode = #tpu.pipeline_mode<synchronous>, transform_indices = @transform_3, window_bounds = array<i64: 3, 192, 192>}, {pipeline_mode = #tpu.pipeline_mode<synchronous>, transform_indices = @transform_4, window_bounds = array<i64: 1, 192>}, {pipeline_mode = #tpu.pipeline_mode<synchronous>, transform_indices = @transform_5, window_bounds = array<i64: 192, 128>}, {pipeline_mode = #tpu.pipeline_mode<synchronous>, transform_indices = @transform_6, window_bounds = array<i64: 1, 128>}, {transform_indices = @transform_7, window_bounds = array<i64: 2, 128>}]} {
    %c0 = arith.constant 0 : index
    %c0_0 = arith.constant 0 : index
    %c0_1 = arith.constant 0 : index
    %0 = vector.load %arg1[%c0, %c0_0, %c0_1] : memref<2x16x768xbf16, #tpu.memory_space<vmem>>, vector<2x16x768xbf16>
    %1 = vector.shape_cast %0 : vector<2x16x768xbf16> to vector<32x768xbf16>
    %2 = tpu.iota {dimensions = array<i32: 1>} : vector<2x16x192xi32>
    %c14_i32 = arith.constant 14 : i32
    %3 = vector.broadcast %c14_i32 : i32 to vector<2x16x192xi32>
    %4 = arith.cmpi slt, %2, %3 : vector<2x16x192xi32>
    %cst = arith.constant 0.000000e+00 : f32
    %5 = vector.broadcast %cst : f32 to vector<32x192xf32>
    %c0_2 = arith.constant 0 : index
    %c0_3 = arith.constant 0 : index
    %c0_4 = arith.constant 0 : index
    %6 = vector.load %arg2[%c0_2, %c0_3, %c0_4] : memref<3x768x192xbf16, #tpu.memory_space<vmem>>, vector<1x768x192xbf16>
    %7 = vector.shape_cast %6 : vector<1x768x192xbf16> to vector<768x192xbf16>
    %cst_5 = arith.constant dense<0.000000e+00> : vector<32x192xf32>
    %8 = tpu.matmul %1, %7, %cst_5 {dimension_numbers = #tpu.dot_dimension_numbers<[1], [0], [0], [1], [0, 0, 1, 1], [], []>} : vector<32x768xbf16>, vector<768x192xbf16>, vector<32x192xf32> -> vector<32x192xf32>
    %9 = arith.addf %5, %8 : vector<32x192xf32>
    %c1 = arith.constant 1 : index
    %c0_6 = arith.constant 0 : index
    %c0_7 = arith.constant 0 : index
    %10 = vector.load %arg2[%c1, %c0_6, %c0_7] : memref<3x768x192xbf16, #tpu.memory_space<vmem>>, vector<1x768x192xbf16>
    %11 = vector.shape_cast %10 : vector<1x768x192xbf16> to vector<768x192xbf16>
    %cst_8 = arith.constant dense<0.000000e+00> : vector<32x192xf32>
    %12 = tpu.matmul %1, %11, %cst_8 {dimension_numbers = #tpu.dot_dimension_numbers<[1], [0], [0], [1], [0, 0, 1, 1], [], []>} : vector<32x768xbf16>, vector<768x192xbf16>, vector<32x192xf32> -> vector<32x192xf32>
    %c31_i32 = arith.constant 31 : i32
    %13 = tpu.dynamic_rotate %12 by %c31_i32 dim 0 : vector<32x192xf32>, i32 -> vector<32x192xf32>
    %14 = arith.addf %9, %13 : vector<32x192xf32>
    %c2 = arith.constant 2 : index
    %c0_9 = arith.constant 0 : index
    %c0_10 = arith.constant 0 : index
    %15 = vector.load %arg2[%c2, %c0_9, %c0_10] : memref<3x768x192xbf16, #tpu.memory_space<vmem>>, vector<1x768x192xbf16>
    %16 = vector.shape_cast %15 : vector<1x768x192xbf16> to vector<768x192xbf16>
    %cst_11 = arith.constant dense<0.000000e+00> : vector<32x192xf32>
    %17 = tpu.matmul %1, %16, %cst_11 {dimension_numbers = #tpu.dot_dimension_numbers<[1], [0], [0], [1], [0, 0, 1, 1], [], []>} : vector<32x768xbf16>, vector<768x192xbf16>, vector<32x192xf32> -> vector<32x192xf32>
    %c30_i32 = arith.constant 30 : i32
    %18 = tpu.dynamic_rotate %17 by %c30_i32 dim 0 : vector<32x192xf32>, i32 -> vector<32x192xf32>
    %19 = arith.addf %14, %18 : vector<32x192xf32>
    %c0_12 = arith.constant 0 : index
    %c0_13 = arith.constant 0 : index
    %20 = vector.load %arg3[%c0_12, %c0_13] : memref<1x192xf32, #tpu.memory_space<vmem>>, vector<1x192xf32>
    %21 = vector.broadcast %20 : vector<1x192xf32> to vector<32x192xf32>
    %22 = arith.addf %19, %21 : vector<32x192xf32>
    %23 = vector.shape_cast %22 : vector<32x192xf32> to vector<2x16x192xf32>
    %cst_14 = arith.constant 0.000000e+00 : f32
    %24 = vector.broadcast %cst_14 : f32 to vector<2x16x192xf32>
    %25 = arith.select %4, %23, %24 : vector<2x16x192xi1>, vector<2x16x192xf32>
    %26 = vector.shape_cast %25 : vector<2x16x192xf32> to vector<32x192xf32>
    %27 = arith.truncf %26 : vector<32x192xf32> to vector<32x192xbf16>
    %c0_15 = arith.constant 0 : index
    %c0_16 = arith.constant 0 : index
    %c0_17 = arith.constant 0 : index
    %28 = vector.load %arg4[%c0_15, %c0_16, %c0_17] : memref<3x192x192xbf16, #tpu.memory_space<vmem>>, vector<1x192x192xbf16>
    %29 = vector.shape_cast %28 : vector<1x192x192xbf16> to vector<192x192xbf16>
    %cst_18 = arith.constant dense<0.000000e+00> : vector<32x192xf32>
    %30 = tpu.matmul %27, %29, %cst_18 {dimension_numbers = #tpu.dot_dimension_numbers<[1], [0], [0], [1], [0, 0, 1, 1], [], []>} : vector<32x192xbf16>, vector<192x192xbf16>, vector<32x192xf32> -> vector<32x192xf32>
    %c1_19 = arith.constant 1 : index
    %c0_20 = arith.constant 0 : index
    %c0_21 = arith.constant 0 : index
    %31 = vector.load %arg4[%c1_19, %c0_20, %c0_21] : memref<3x192x192xbf16, #tpu.memory_space<vmem>>, vector<1x192x192xbf16>
    %32 = vector.shape_cast %31 : vector<1x192x192xbf16> to vector<192x192xbf16>
    %cst_22 = arith.constant dense<0.000000e+00> : vector<32x192xf32>
    %33 = tpu.matmul %27, %32, %cst_22 {dimension_numbers = #tpu.dot_dimension_numbers<[1], [0], [0], [1], [0, 0, 1, 1], [], []>} : vector<32x192xbf16>, vector<192x192xbf16>, vector<32x192xf32> -> vector<32x192xf32>
    %c2_23 = arith.constant 2 : index
    %c0_24 = arith.constant 0 : index
    %c0_25 = arith.constant 0 : index
    %34 = vector.load %arg4[%c2_23, %c0_24, %c0_25] : memref<3x192x192xbf16, #tpu.memory_space<vmem>>, vector<1x192x192xbf16>
    %35 = vector.shape_cast %34 : vector<1x192x192xbf16> to vector<192x192xbf16>
    %cst_26 = arith.constant dense<0.000000e+00> : vector<32x192xf32>
    %36 = tpu.matmul %27, %35, %cst_26 {dimension_numbers = #tpu.dot_dimension_numbers<[1], [0], [0], [1], [0, 0, 1, 1], [], []>} : vector<32x192xbf16>, vector<192x192xbf16>, vector<32x192xf32> -> vector<32x192xf32>
    %c1_i32 = arith.constant 1 : i32
    %37 = tpu.dynamic_rotate %30 by %c1_i32 dim 0 : vector<32x192xf32>, i32 -> vector<32x192xf32>
    %38 = arith.addf %37, %33 : vector<32x192xf32>
    %c31_i32_27 = arith.constant 31 : i32
    %39 = tpu.dynamic_rotate %36 by %c31_i32_27 dim 0 : vector<32x192xf32>, i32 -> vector<32x192xf32>
    %40 = arith.addf %38, %39 : vector<32x192xf32>
    %c0_28 = arith.constant 0 : index
    %c0_29 = arith.constant 0 : index
    %41 = vector.load %arg5[%c0_28, %c0_29] : memref<1x192xf32, #tpu.memory_space<vmem>>, vector<1x192xf32>
    %42 = vector.broadcast %41 : vector<1x192xf32> to vector<32x192xf32>
    %43 = arith.addf %40, %42 : vector<32x192xf32>
    %44 = vector.shape_cast %43 : vector<32x192xf32> to vector<2x16x192xf32>
    %cst_30 = arith.constant -1.000000e+30 : f32
    %45 = vector.broadcast %cst_30 : f32 to vector<2x16x192xf32>
    %46 = arith.select %4, %44, %45 : vector<2x16x192xi1>, vector<2x16x192xf32>
    %cst_31 = arith.constant dense<0xFF800000> : vector<2x192xf32>
    %47 = vector.multi_reduction <maximumf>, %46, %cst_31 [1] : vector<2x16x192xf32> to vector<2x192xf32>
    %c0_32 = arith.constant 0 : index
    %c0_33 = arith.constant 0 : index
    %48 = vector.load %arg6[%c0_32, %c0_33] : memref<192x128xf32, #tpu.memory_space<vmem>>, vector<192x128xf32>
    %cst_34 = arith.constant dense<0.000000e+00> : vector<2x128xf32>
    %49 = tpu.matmul %47, %48, %cst_34 {dimension_numbers = #tpu.dot_dimension_numbers<[1], [0], [0], [1], [0, 0, 1, 1], [], []>} : vector<2x192xf32>, vector<192x128xf32>, vector<2x128xf32> -> vector<2x128xf32>
    %c0_35 = arith.constant 0 : index
    %c0_36 = arith.constant 0 : index
    %50 = vector.load %arg7[%c0_35, %c0_36] : memref<1x128xf32, #tpu.memory_space<vmem>>, vector<1x128xf32>
    %51 = vector.broadcast %50 : vector<1x128xf32> to vector<2x128xf32>
    %52 = arith.addf %49, %51 : vector<2x128xf32>
    %c0_37 = arith.constant 0 : index
    %c0_38 = arith.constant 0 : index
    %53 = vector.load %arg8[%c0_37, %c0_38] : memref<2x128xf32, #tpu.memory_space<vmem>>, vector<2x128xf32>
    tpu.vector_store %arg8[%c0_37, %c0_38], %52 {strides = array<i32>} : memref<2x128xf32, #tpu.memory_space<vmem>>, vector<2x128xf32>,
    return
  }
  func.func @transform_0(%arg0: i32) -> (i32, i32, i32) {
    %c0_i32 = arith.constant 0 : i32
    %c0_i32_0 = arith.constant 0 : i32
    %c0_i32_1 = arith.constant 0 : i32
    return %arg0, %c0_i32, %c0_i32_0 : i32, i32, i32
  }
  func.func @transform_1(%arg0: i32) -> (i32, i32, i32) {
    %c0_i32 = arith.constant 0 : i32
    %c0_i32_0 = arith.constant 0 : i32
    %c0_i32_1 = arith.constant 0 : i32
    %c0_i32_2 = arith.constant 0 : i32
    return %c0_i32, %c0_i32_0, %c0_i32_1 : i32, i32, i32
  }
  func.func @transform_2(%arg0: i32) -> (i32, i32) {
    %c0_i32 = arith.constant 0 : i32
    %c0_i32_0 = arith.constant 0 : i32
    %c0_i32_1 = arith.constant 0 : i32
    return %c0_i32, %c0_i32_0 : i32, i32
  }
  func.func @transform_3(%arg0: i32) -> (i32, i32, i32) {
    %c0_i32 = arith.constant 0 : i32
    %c0_i32_0 = arith.constant 0 : i32
    %c0_i32_1 = arith.constant 0 : i32
    %c0_i32_2 = arith.constant 0 : i32
    return %c0_i32, %c0_i32_0, %c0_i32_1 : i32, i32, i32
  }
  func.func @transform_4(%arg0: i32) -> (i32, i32) {
    %c0_i32 = arith.constant 0 : i32
    %c0_i32_0 = arith.constant 0 : i32
    %c0_i32_1 = arith.constant 0 : i32
    return %c0_i32, %c0_i32_0 : i32, i32
  }
  func.func @transform_5(%arg0: i32) -> (i32, i32) {
    %c0_i32 = arith.constant 0 : i32
    %c0_i32_0 = arith.constant 0 : i32
    %c0_i32_1 = arith.constant 0 : i32
    return %c0_i32, %c0_i32_0 : i32, i32
  }
  func.func @transform_6(%arg0: i32) -> (i32, i32) {
    %c0_i32 = arith.constant 0 : i32
    %c0_i32_0 = arith.constant 0 : i32
    %c0_i32_1 = arith.constant 0 : i32
    return %c0_i32, %c0_i32_0 : i32, i32
  }
  func.func @transform_7(%arg0: i32) -> (i32, i32) {
    %c0_i32 = arith.constant 0 : i32
    %c0_i32_0 = arith.constant 0 : i32
    return %arg0, %c0_i32 : i32, i32
  }
}

</mosaic_0001>

<bundles_post_ra>
// kernel: bert2conv_forward.1
= control target key start
LH: loop header
LB: loop body
LE: loop exit
PB: predicated region body
PF: predicated region fallthrough
CT: control target
= control target key end

     0   :  { %s6005_s0 = inlined_call_operand.vmem [shape: bf16[2,16,768], index: 0, kind: input, shape index: {}]   ;;  %s6006_s1 = inlined_call_operand.vmem [shape: bf16[3,768,192], index: 1, kind: input, shape index: {}]   ;;  %s6007_s2 = inlined_call_operand.vmem [shape: f32[1,192], index: 2, kind: input, shape index: {}]   ;;  %s6008_s3 = inlined_call_operand.vmem [shape: bf16[3,192,192], index: 3, kind: input, shape index: {}]   ;;  %s6009_s4 = inlined_call_operand.vmem [shape: f32[1,192], index: 4, kind: input, shape index: {}]   ;;  %s6010_s5 = inlined_call_operand.vmem [shape: f32[192,128], index: 5, kind: input, shape index: {}]   ;;  %s6011_s6 = inlined_call_operand.vmem [shape: f32[1,128], index: 6, kind: input, shape index: {}]   ;;  %s6012_s7 = inlined_call_operand.hbm [shape: f32[2,128], index: 7, kind: output, shape index: {}]  }
   0x1   :  { %v3954_v0 = vld [vmem:[%s6006_s1 + $0x304] ss:$8 sps:$4 sm:$0xff]   ;;  %v3956_v1 = vld [vmem:[%s6006_s1 + $0x300] ss:$8 sps:$4 sm:$0xff]   ;;  %v3959_v3 = vld [vmem:[%s6006_s1 + $0x314] ss:$8 sps:$4 sm:$0xff]  }
   0x2   :  { %778 = vmatprep.subr.bf16.mxu0 %v3954_v0  ;;  %v3957_v2 = vld [vmem:[%s6006_s1 + $0x4] ss:$8 sps:$4 sm:$0xff]   ;;  %v3961_v4 = vld [vmem:[%s6006_s1] ss:$8 sps:$4 sm:$0xff]   ;;  %v3962_v5 = vld [vmem:[%s6006_s1 + $0x310] ss:$8 sps:$4 sm:$0xff]  }
   0x3   :  { %779 = vmatpush1.bf16.msra.mxu0 %v3956_v1  ;;  %1434 = vmatprep.subr.bf16.mxu1 %v3957_v2  ;;  %v3963_v6 = vld [vmem:[%s6006_s1 + $0x14] ss:$8 sps:$4 sm:$0xff]   ;;  %v3965_v7 = vld [vmem:[%s6006_s1 + $0x324] ss:$8 sps:$4 sm:$0xff]   ;;  %v3967_v8 = vld [vmem:[%s6006_s1 + $0x10] ss:$8 sps:$4 sm:$0xff]  }
   0x4   :  { %780 = vmatprep.subr.bf16.mxu0 %v3959_v3  ;;  %1435 = vmatpush1.bf16.msra.mxu1 %v3961_v4  ;;  %v3968_v9 = vld [vmem:[%s6006_s1 + $0x320] ss:$8 sps:$4 sm:$0xff]   ;;  %v3969_v10 = vld [vmem:[%s6006_s1 + $0x24] ss:$8 sps:$4 sm:$0xff]   ;;  %v3971_v11 = vld [vmem:[%s6006_s1 + $0x334] ss:$8 sps:$4 sm:$0xff]  }
   0x5   :  { %1436 = vmatprep.subr.bf16.mxu1 %v3963_v6  ;;  %v3973_v12 = vld [vmem:[%s6006_s1 + $0x20] ss:$8 sps:$4 sm:$0xff]   ;;  %v3975_v13 = vld [vmem:[%s6006_s1 + $0x34] ss:$8 sps:$4 sm:$0xff]   ;;  %v3974_v14 = vld [vmem:[%s6006_s1 + $0x330] ss:$8 sps:$4 sm:$0xff]  }
   0x6   :  { %v3977_v15 = vld [vmem:[%s6006_s1 + $0x344] ss:$8 sps:$4 sm:$0xff]   ;;  %v3979_v16 = vld [vmem:[%s6006_s1 + $0x30] ss:$8 sps:$4 sm:$0xff]   ;;  %v3980_v18 = vld [vmem:[%s6006_s1 + $0x340] ss:$8 sps:$4 sm:$0xff]  }
   0x7   :  { %781 = vmatpush1.bf16.msra.mxu0 %v3962_v5  ;;  %v3981_v17 = vld [vmem:[%s6006_s1 + $0x44] ss:$8 sps:$4 sm:$0xff]   ;;  %v3983_v19 = vld [vmem:[%s6006_s1 + $0x354] ss:$8 sps:$4 sm:$0xff]   ;;  %v3985_v20 = vld [vmem:[%s6006_s1 + $0x40] ss:$8 sps:$4 sm:$0xff]  }
   0x8   :  { %782 = vmatprep.subr.bf16.mxu0 %v3965_v7  ;;  %1437 = vmatpush1.bf16.msra.mxu1 %v3967_v8  ;;  %v3987_v21 = vld [vmem:[%s6006_s1 + $0x54] ss:$8 sps:$4 sm:$0xff]   ;;  %v3986_v22 = vld [vmem:[%s6006_s1 + $0x350] ss:$8 sps:$4 sm:$0xff]   ;;  %v3989_v23 = vld [vmem:[%s6006_s1 + $0x364] ss:$8 sps:$4 sm:$0xff]  }
   0x9   :  { %1438 = vmatprep.subr.bf16.mxu1 %v3969_v10  ;;  %v3991_v24 = vld [vmem:[%s6006_s1 + $0x50] ss:$8 sps:$4 sm:$0xff]   ;;  %v3993_v25 = vld [vmem:[%s6006_s1 + $0x64] ss:$8 sps:$4 sm:$0xff]   ;;  %v3992_v26 = vld [vmem:[%s6006_s1 + $0x360] ss:$8 sps:$4 sm:$0xff]  }
   0xa   :  { %v3995_v27 = vld [vmem:[%s6006_s1 + $0x374] ss:$8 sps:$4 sm:$0xff]   ;;  %v3997_v28 = vld [vmem:[%s6006_s1 + $0x60] ss:$8 sps:$4 sm:$0xff]   ;;  %v3998_v30 = vld [vmem:[%s6006_s1 + $0x370] ss:$8 sps:$4 sm:$0xff]  }
   0xb   :  { %783 = vmatpush1.bf16.msra.mxu0 %v3968_v9  ;;  %v3999_v29 = vld [vmem:[%s6006_s1 + $0x74] ss:$8 sps:$4 sm:$0xff]   ;;  %v4001_v31 = vld [vmem:[%s6006_s1 + $0x384] ss:$8 sps:$4 sm:$0xff]   ;;  %v4003_v32 = vld [vmem:[%s6006_s1 + $0x70] ss:$8 sps:$4 sm:$0xff]  }
   0xc   :  { %784 = vmatprep.subr.bf16.mxu0 %v3971_v11  ;;  %1439 = vmatpush1.bf16.msra.mxu1 %v3973_v12  ;;  %v4005_v33 = vld [vmem:[%s6006_s1 + $0x84] ss:$8 sps:$4 sm:$0xff]   ;;  %v4004_v34 = vld [vmem:[%s6006_s1 + $0x380] ss:$8 sps:$4 sm:$0xff]   ;;  %v4007_v35 = vld [vmem:[%s6006_s1 + $0x394] ss:$8 sps:$4 sm:$0xff]  }
   0xd   :  { %1440 = vmatprep.subr.bf16.mxu1 %v3975_v13  ;;  %v4009_v36 = vld [vmem:[%s6006_s1 + $0x80] ss:$8 sps:$4 sm:$0xff]   ;;  %v4011_v37 = vld [vmem:[%s6006_s1 + $0x94] ss:$8 sps:$4 sm:$0xff]   ;;  %v4010_v38 = vld [vmem:[%s6006_s1 + $0x390] ss:$8 sps:$4 sm:$0xff]  }
   0xe   :  { %v4013_v39 = vld [vmem:[%s6006_s1 + $0x3a4] ss:$8 sps:$4 sm:$0xff]   ;;  %v4015_v40 = vld [vmem:[%s6006_s1 + $0x90] ss:$8 sps:$4 sm:$0xff]   ;;  %v4016_v42 = vld [vmem:[%s6006_s1 + $0x3a0] ss:$8 sps:$4 sm:$0xff]  }
   0xf   :  { %785 = vmatpush1.bf16.msra.mxu0 %v3974_v14  ;;  %v4017_v41 = vld [vmem:[%s6006_s1 + $0xa4] ss:$8 sps:$4 sm:$0xff]   ;;  %v4019_v43 = vld [vmem:[%s6006_s1 + $0x3b4] ss:$8 sps:$4 sm:$0xff]   ;;  %v4021_v44 = vld [vmem:[%s6006_s1 + $0xa0] ss:$8 sps:$4 sm:$0xff]  }
  0x10   :  { %786 = vmatprep.subr.bf16.mxu0 %v3977_v15  ;;  %1441 = vmatpush1.bf16.msra.mxu1 %v3979_v16  ;;  %v4022_v45 = vld [vmem:[%s6006_s1 + $0x3b0] ss:$8 sps:$4 sm:$0xff]   ;;  %v4023_v46 = vld [vmem:[%s6006_s1 + $0xb4] ss:$8 sps:$4 sm:$0xff]   ;;  %v4025_v48 = vld [vmem:[%s6006_s1 + $0x3c4] ss:$8 sps:$4 sm:$0xff]  }
  0x11   :  { %1442 = vmatprep.subr.bf16.mxu1 %v3981_v17  ;;  %v4049_v47 = vld [vmem:[%s6005_s0 + $0x4] ss:$24 sps:$4 sm:$0xff]   ;;  %v4027_v49 = vld [vmem:[%s6006_s1 + $0xb0] ss:$8 sps:$4 sm:$0xff]   ;;  %v4028_v51 = vld [vmem:[%s6006_s1 + $0x3c0] ss:$8 sps:$4 sm:$0xff]  }
  0x12   :  { %810 = vmatprep.mubr.bf16.mxu0 %v4049_v47  ;;  %v4029_v50 = vld [vmem:[%s6006_s1 + $0xc4] ss:$8 sps:$4 sm:$0xff]   ;;  %1466 = vmatprep.mubr.bf16.mxu1 %v4049_v47  ;;  %v4031_v52 = vld [vmem:[%s6006_s1 + $0x3d4] ss:$8 sps:$4 sm:$0xff]   ;;  %v4033_v53 = vld [vmem:[%s6006_s1 + $0xc0] ss:$8 sps:$4 sm:$0xff]  }
  0x13   :  { %787 = vmatpush1.bf16.msra.mxu0 %v3980_v18  ;;  %v4035_v54 = vld [vmem:[%s6006_s1 + $0xd4] ss:$8 sps:$4 sm:$0xff]   ;;  %v4034_v55 = vld [vmem:[%s6006_s1 + $0x3d0] ss:$8 sps:$4 sm:$0xff]   ;;  %v4037_v56 = vld [vmem:[%s6006_s1 + $0x3e4] ss:$8 sps:$4 sm:$0xff]  }
  0x14   :  { %788 = vmatprep.subr.bf16.mxu0 %v3983_v19  ;;  %1443 = vmatpush1.bf16.msra.mxu1 %v3985_v20  ;;  %v4039_v57 = vld [vmem:[%s6006_s1 + $0xd0] ss:$8 sps:$4 sm:$0xff]   ;;  %v4041_v58 = vld [vmem:[%s6006_s1 + $0xe4] ss:$8 sps:$4 sm:$0xff]   ;;  %v4040_v59 = vld [vmem:[%s6006_s1 + $0x3e0] ss:$8 sps:$4 sm:$0xff]  }
  0x15   :  { %1444 = vmatprep.subr.bf16.mxu1 %v3987_v21  ;;  %v4043_v60 = vld [vmem:[%s6006_s1 + $0x3f4] ss:$8 sps:$4 sm:$0xff]   ;;  %v4045_v61 = vld [vmem:[%s6006_s1 + $0xe0] ss:$8 sps:$4 sm:$0xff]   ;;  %v4046_v63 = vld [vmem:[%s6006_s1 + $0x3f0] ss:$8 sps:$4 sm:$0xff]  }
  0x16   :  { %v4047_v62 = vld [vmem:[%s6006_s1 + $0xf4] ss:$8 sps:$4 sm:$0xff]   ;;  %v4053_v0 = vld [vmem:[%s6006_s1 + $0x404] ss:$8 sps:$4 sm:$0xff]   ;;  %v4054_v1 = vld [vmem:[%s6006_s1 + $0xf0] ss:$8 sps:$4 sm:$0xff]  }
  0x17   :  { %789 = vmatpush1.bf16.msra.mxu0 %v3986_v22  ;;  %v4055_v2 = vld [vmem:[%s6005_s0] ss:$24 sps:$4 sm:$0xff]   ;;  %v4058_v3 = vld [vmem:[%s6006_s1 + $0x104] ss:$8 sps:$4 sm:$0xff]   ;;  %v4061_v5 = vld [vmem:[%s6006_s1 + $0x414] ss:$8 sps:$4 sm:$0xff]  }
  0x18   :  { %790 = vmatprep.subr.bf16.mxu0 %v3989_v23  ;;  %1445 = vmatpush1.bf16.msra.mxu1 %v3991_v24  ;;  %v4051_v4 = vld [vmem:[%s6006_s1 + $0x400] ss:$8 sps:$4 sm:$0xff]   ;;  %v4064_v7 = vld [vmem:[%s6006_s1 + $0x114] ss:$8 sps:$4 sm:$0xff]   ;;  %v4059_v8 = vld [vmem:[%s6006_s1 + $0x410] ss:$8 sps:$4 sm:$0xff]  }
  0x19   :  { %1446 = vmatprep.subr.bf16.mxu1 %v3993_v25  ;;  %v4056_v6 = vld [vmem:[%s6006_s1 + $0x100] ss:$8 sps:$4 sm:$0xff]   ;;  %v4067_v9 = vld [vmem:[%s6006_s1 + $0x424] ss:$8 sps:$4 sm:$0xff]   ;;  %v4062_v10 = vld [vmem:[%s6006_s1 + $0x110] ss:$8 sps:$4 sm:$0xff]  }
  0x1a   :  { %v4070_v11 = vld [vmem:[%s6006_s1 + $0x124] ss:$8 sps:$4 sm:$0xff]   ;;  %v4065_v12 = vld [vmem:[%s6006_s1 + $0x420] ss:$8 sps:$4 sm:$0xff]   ;;  %v4073_v13 = vld [vmem:[%s6006_s1 + $0x434] ss:$8 sps:$4 sm:$0xff]  }
  0x1b   :  { %791 = vmatpush1.bf16.msra.mxu0 %v3992_v26  ;;  %v4068_v14 = vld [vmem:[%s6006_s1 + $0x120] ss:$8 sps:$4 sm:$0xff]   ;;  %v4076_v15 = vld [vmem:[%s6006_s1 + $0x134] ss:$8 sps:$4 sm:$0xff]   ;;  %v4071_v16 = vld [vmem:[%s6006_s1 + $0x430] ss:$8 sps:$4 sm:$0xff]  }
  0x1c   :  { %792 = vmatprep.subr.bf16.mxu0 %v3995_v27  ;;  %1447 = vmatpush1.bf16.msra.mxu1 %v3997_v28  ;;  %v4079_v17 = vld [vmem:[%s6006_s1 + $0x444] ss:$8 sps:$4 sm:$0xff]   ;;  %v4074_v18 = vld [vmem:[%s6006_s1 + $0x130] ss:$8 sps:$4 sm:$0xff]   ;;  %v4077_v20 = vld [vmem:[%s6006_s1 + $0x440] ss:$8 sps:$4 sm:$0xff]  }
  0x1d   :  { %1448 = vmatprep.subr.bf16.mxu1 %v3999_v29  ;;  %v4082_v19 = vld [vmem:[%s6006_s1 + $0x144] ss:$8 sps:$4 sm:$0xff]   ;;  %v4080_v21 = vld [vmem:[%s6006_s1 + $0x140] ss:$8 sps:$4 sm:$0xff]   ;;  %v4085_v22 = vld [vmem:[%s6006_s1 + $0x454] ss:$8 sps:$4 sm:$0xff]  }
  0x1e   :  { %v4088_v23 = vld [vmem:[%s6006_s1 + $0x154] ss:$8 sps:$4 sm:$0xff]   ;;  %v4083_v25 = vld [vmem:[%s6006_s1 + $0x450] ss:$8 sps:$4 sm:$0xff]   ;;  %v4091_v27 = vld [vmem:[%s6006_s1 + $0x464] ss:$8 sps:$4 sm:$0xff]  }
  0x1f   :  { %793 = vmatpush1.bf16.msra.mxu0 %v3998_v30  ;;  %v4137_v24 = vld [vmem:[%s6005_s0 + $0x34] ss:$24 sps:$4 sm:$0xff]   ;;  %v4142_v26 = vld [vmem:[%s6005_s0 + $0x30] ss:$24 sps:$4 sm:$0xff]  }
  0x20   :  { %794 = vmatprep.subr.bf16.mxu0 %v4001_v31  ;;  %1449 = vmatpush1.bf16.msra.mxu1 %v4003_v32  ;;  %v4086_v28 = vld [vmem:[%s6006_s1 + $0x150] ss:$8 sps:$4 sm:$0xff]   ;;  %v4094_v29 = vld [vmem:[%s6006_s1 + $0x164] ss:$8 sps:$4 sm:$0xff]   ;;  %v4089_v30 = vld [vmem:[%s6006_s1 + $0x460] ss:$8 sps:$4 sm:$0xff]  }
  0x21   :  { %1450 = vmatprep.subr.bf16.mxu1 %v4005_v33  ;;  %v4092_v31 = vld [vmem:[%s6006_s1 + $0x160] ss:$8 sps:$4 sm:$0xff]   ;;  %v4097_v32 = vld [vmem:[%s6006_s1 + $0x474] ss:$8 sps:$4 sm:$0xff]   ;;  %v4154_v33 = vld [vmem:[%s6005_s0 + $0xc] ss:$24 sps:$4 sm:$0xff]  }
  0x22   :  { %v4113_v47 = vld [vmem:[%s6006_s1 + $0x4a0] ss:$8 sps:$4 sm:$0xff]  }
  0x23   :  { %795 = vmatpush1.bf16.msra.mxu0 %v4004_v34  ;;  %v4100_v34 = vld [vmem:[%s6006_s1 + $0x174] ss:$8 sps:$4 sm:$0xff]  }
  0x24   :  { %796 = vmatprep.subr.bf16.mxu0 %v4007_v35  ;;  %1451 = vmatpush1.bf16.msra.mxu1 %v4009_v36  ;;  %v4095_v35 = vld [vmem:[%s6006_s1 + $0x470] ss:$8 sps:$4 sm:$0xff]   ;;  %v4103_v36 = vld [vmem:[%s6006_s1 + $0x484] ss:$8 sps:$4 sm:$0xff]  }
  0x25   :  { %1452 = vmatprep.subr.bf16.mxu1 %v4011_v37  ;;  %v4098_v37 = vld [vmem:[%s6006_s1 + $0x170] ss:$8 sps:$4 sm:$0xff]  }
  0x27   :  { %797 = vmatpush1.bf16.msra.mxu0 %v4010_v38  ;;  %v4106_v38 = vld [vmem:[%s6006_s1 + $0x184] ss:$8 sps:$4 sm:$0xff]  }
  0x28   :  { %798 = vmatprep.subr.bf16.mxu0 %v4013_v39  ;;  %1453 = vmatpush1.bf16.msra.mxu1 %v4015_v40  ;;  %v4101_v39 = vld [vmem:[%s6006_s1 + $0x480] ss:$8 sps:$4 sm:$0xff]   ;;  %v4109_v40 = vld [vmem:[%s6006_s1 + $0x494] ss:$8 sps:$4 sm:$0xff]  }
  0x29   :  { %1454 = vmatprep.subr.bf16.mxu1 %v4017_v41  ;;  %v4104_v41 = vld [vmem:[%s6006_s1 + $0x180] ss:$8 sps:$4 sm:$0xff]  }
  0x2b   :  { %799 = vmatpush1.bf16.msra.mxu0 %v4016_v42  ;;  %v4112_v42 = vld [vmem:[%s6006_s1 + $0x194] ss:$8 sps:$4 sm:$0xff]  }
  0x2c   :  { %800 = vmatprep.subr.bf16.mxu0 %v4019_v43  ;;  %1455 = vmatpush1.bf16.msra.mxu1 %v4021_v44  ;;  %v4107_v43 = vld [vmem:[%s6006_s1 + $0x490] ss:$8 sps:$4 sm:$0xff]   ;;  %v4115_v44 = vld [vmem:[%s6006_s1 + $0x4a4] ss:$8 sps:$4 sm:$0xff]  }
  0x2d   :  { %1456 = vmatprep.subr.bf16.mxu1 %v4023_v46  ;;  %v4118_v46 = vld [vmem:[%s6006_s1 + $0x1a4] ss:$8 sps:$4 sm:$0xff]  }
  0x2f   :  { %801 = vmatpush1.bf16.msra.mxu0 %v4022_v45  ;;  %v4110_v45 = vld [vmem:[%s6006_s1 + $0x190] ss:$8 sps:$4 sm:$0xff]  }
  0x30   :  { %802 = vmatprep.subr.bf16.mxu0 %v4025_v48  ;;  %1457 = vmatpush1.bf16.msra.mxu1 %v4027_v49  ;;  %v4121_v48 = vld [vmem:[%s6006_s1 + $0x4b4] ss:$8 sps:$4 sm:$0xff]   ;;  %v4116_v49 = vld [vmem:[%s6006_s1 + $0x1a0] ss:$8 sps:$4 sm:$0xff]  }
  0x31   :  { %1458 = vmatprep.subr.bf16.mxu1 %v4029_v50  ;;  %v4124_v50 = vld [vmem:[%s6006_s1 + $0x1b4] ss:$8 sps:$4 sm:$0xff]  }
  0x33   :  { %803 = vmatpush1.bf16.msra.mxu0 %v4028_v51  ;;  %v4119_v51 = vld [vmem:[%s6006_s1 + $0x4b0] ss:$8 sps:$4 sm:$0xff]  }
  0x34   :  { %804 = vmatprep.subr.bf16.mxu0 %v4031_v52  ;;  %1459 = vmatpush1.bf16.msra.mxu1 %v4033_v53  ;;  %v4127_v52 = vld [vmem:[%s6006_s1 + $0x4c4] ss:$8 sps:$4 sm:$0xff]   ;;  %v4122_v53 = vld [vmem:[%s6006_s1 + $0x1b0] ss:$8 sps:$4 sm:$0xff]  }
  0x35   :  { %1460 = vmatprep.subr.bf16.mxu1 %v4035_v54  ;;  %v4130_v54 = vld [vmem:[%s6006_s1 + $0x1c4] ss:$8 sps:$4 sm:$0xff]  }
  0x37   :  { %805 = vmatpush1.bf16.msra.mxu0 %v4034_v55  ;;  %v4125_v55 = vld [vmem:[%s6006_s1 + $0x4c0] ss:$8 sps:$4 sm:$0xff]  }
  0x38   :  { %806 = vmatprep.subr.bf16.mxu0 %v4037_v56  ;;  %1461 = vmatpush1.bf16.msra.mxu1 %v4039_v57  ;;  %v4133_v56 = vld [vmem:[%s6006_s1 + $0x4d4] ss:$8 sps:$4 sm:$0xff]   ;;  %v4128_v57 = vld [vmem:[%s6006_s1 + $0x1c0] ss:$8 sps:$4 sm:$0xff]  }
  0x39   :  { %1462 = vmatprep.subr.bf16.mxu1 %v4041_v58  ;;  %v4136_v58 = vld [vmem:[%s6006_s1 + $0x1d4] ss:$8 sps:$4 sm:$0xff]  }
  0x3b   :  { %807 = vmatpush1.bf16.msra.mxu0 %v4040_v59  ;;  %v4131_v59 = vld [vmem:[%s6006_s1 + $0x4d0] ss:$8 sps:$4 sm:$0xff]  }
  0x3c   :  { %808 = vmatprep.subr.bf16.mxu0 %v4043_v60  ;;  %1463 = vmatpush1.bf16.msra.mxu1 %v4045_v61  ;;  %v4141_v60 = vld [vmem:[%s6006_s1 + $0x4e4] ss:$8 sps:$4 sm:$0xff]   ;;  %v4134_v61 = vld [vmem:[%s6006_s1 + $0x1d0] ss:$8 sps:$4 sm:$0xff]  }
  0x3d   :  { %1464 = vmatprep.subr.bf16.mxu1 %v4047_v62  ;;  %v4145_v62 = vld [vmem:[%s6006_s1 + $0x1e4] ss:$8 sps:$4 sm:$0xff]  }
  0x3f   :  { %809 = vmatpush1.bf16.msra.mxu0 %v4046_v63  ;;  %v4139_v63 = vld [vmem:[%s6006_s1 + $0x4e0] ss:$8 sps:$4 sm:$0xff]  }
  0x40   :  { %831 = vmatprep.subr.bf16.mxu0 %v4053_v0  ;;  %1465 = vmatpush1.bf16.msra.mxu1 %v4054_v1  ;;  %v4148_v0 = vld [vmem:[%s6006_s1 + $0x4f4] ss:$8 sps:$4 sm:$0xff]   ;;  %v4143_v1 = vld [vmem:[%s6006_s1 + $0x1e0] ss:$8 sps:$4 sm:$0xff]  }
  0x41   :  { %1487 = vmatprep.subr.bf16.mxu1 %v4058_v3  ;;  %v4146_v3 = vld [vmem:[%s6006_s1 + $0x4f0] ss:$8 sps:$4 sm:$0xff]  }
  0x42   :  { %811 = vmatmul.mubr.bf16.vlgmr.msra.gmra.mrb[0].mxu0 %v4055_v2 }
  0x43   :  { %832 = vmatpush1.bf16.msra.mxu0 %v4051_v4  ;;  %1467 = vmatmul.mubr.bf16.vlgmr.msra.gmra.mrb[0].mxu1 %v4055_v2  ;;  %v4151_v2 = vld [vmem:[%s6006_s1 + $0x1f4] ss:$8 sps:$4 sm:$0xff]   ;;  %v4149_v4 = vld [vmem:[%s6006_s1 + $0x1f0] ss:$8 sps:$4 sm:$0xff]  }
  0x44   :  { %833 = vmatprep.subr.bf16.mxu0 %v4061_v5  ;;  %1488 = vmatpush1.bf16.msra.mxu1 %v4056_v6  ;;  %v4157_v5 = vld [vmem:[%s6006_s1 + $0x504] ss:$8 sps:$4 sm:$0xff]   ;;  %v4989_v6 = vld [vmem:[%s6005_s0 + $0x8] ss:$24 sps:$4 sm:$0xff]  }
  0x45   :  { %1489 = vmatprep.subr.bf16.mxu1 %v4064_v7  ;;  %820 = vmatprep.mubr.bf16.mxu0 %v4137_v24  ;;  %v4160_v7 = vld [vmem:[%s6006_s1 + $0x204] ss:$8 sps:$4 sm:$0xff]  }
  0x46   :  { %1476 = vmatprep.mubr.bf16.mxu1 %v4137_v24  ;;  %v4181_v24 = vld [vmem:[%s6006_s1 + $0x544] ss:$8 sps:$4 sm:$0xff]  }
  0x47   :  { %834 = vmatpush1.bf16.msra.mxu0 %v4059_v8  ;;  %v4155_v8 = vld [vmem:[%s6006_s1 + $0x500] ss:$8 sps:$4 sm:$0xff]  }
  0x48   :  { %835 = vmatprep.subr.bf16.mxu0 %v4067_v9  ;;  %1490 = vmatpush1.bf16.msra.mxu1 %v4062_v10  ;;  %v5000_v9 = vld [vmem:[%s6005_s0 + $0x3c] ss:$24 sps:$4 sm:$0xff]  }
  0x49   :  { %1491 = vmatprep.subr.bf16.mxu1 %v4070_v11  ;;  %v4163_v10 = vld [vmem:[%s6006_s1 + $0x514] ss:$8 sps:$4 sm:$0xff]   ;;  %v4158_v11 = vld [vmem:[%s6006_s1 + $0x200] ss:$8 sps:$4 sm:$0xff]  }
  0x4a   :  { %821 = vmatmul.mubr.bf16.gmra.mrb[4].mxu0 %v4142_v26 }
  0x4b   :  { %836 = vmatpush1.bf16.msra.mxu0 %v4065_v12  ;;  %1477 = vmatmul.mubr.bf16.gmra.mrb[4].mxu1 %v4142_v26  ;;  %v4166_v12 = vld [vmem:[%s6006_s1 + $0x214] ss:$8 sps:$4 sm:$0xff]   ;;  %v4184_v26 = vld [vmem:[%s6006_s1 + $0x244] ss:$8 sps:$4 sm:$0xff]  }
  0x4c   :  { %837 = vmatprep.subr.bf16.mxu0 %v4073_v13  ;;  %1492 = vmatpush1.bf16.msra.mxu1 %v4068_v14  ;;  %v4161_v13 = vld [vmem:[%s6006_s1 + $0x510] ss:$8 sps:$4 sm:$0xff]   ;;  %v4169_v14 = vld [vmem:[%s6006_s1 + $0x524] ss:$8 sps:$4 sm:$0xff]  }
  0x4d   :  { %1493 = vmatprep.subr.bf16.mxu1 %v4076_v15  ;;  %863 = vmatprep.mubr.bf16.mxu0 %v4154_v33  ;;  %v4164_v15 = vld [vmem:[%s6006_s1 + $0x210] ss:$8 sps:$4 sm:$0xff]  }
  0x4e   :  { %1519 = vmatprep.mubr.bf16.mxu1 %v4154_v33  ;;  %v4188_v33 = vld [vmem:[%s6006_s1 + $0x250] ss:$8 sps:$4 sm:$0xff]  }
  0x4f   :  { %838 = vmatpush1.bf16.msra.mxu0 %v4071_v16  ;;  %v4172_v16 = vld [vmem:[%s6006_s1 + $0x224] ss:$8 sps:$4 sm:$0xff]  }
  0x50   :  { %839 = vmatprep.subr.bf16.mxu0 %v4079_v17  ;;  %1494 = vmatpush1.bf16.msra.mxu1 %v4074_v18  ;;  %v5030_v17 = vld [vmem:[%s6005_s0 + $0x38] ss:$24 sps:$4 sm:$0xff]   ;;  %v4167_v18 = vld [vmem:[%s6006_s1 + $0x520] ss:$8 sps:$4 sm:$0xff]  }
  0x51   :  { %1495 = vmatprep.subr.bf16.mxu1 %v4082_v19  ;;  %v5038_v19 = vld [vmem:[%s6005_s0 + $0x14] ss:$24 sps:$4 sm:$0xff]  }
  0x53   :  { %840 = vmatpush1.bf16.msra.mxu0 %v4077_v20  ;;  %v4175_v20 = vld [vmem:[%s6006_s1 + $0x534] ss:$8 sps:$4 sm:$0xff]  }
  0x54   :  { %841 = vmatprep.subr.bf16.mxu0 %v4085_v22  ;;  %1496 = vmatpush1.bf16.msra.mxu1 %v4080_v21  ;;  %v4170_v21 = vld [vmem:[%s6006_s1 + $0x220] ss:$8 sps:$4 sm:$0xff]   ;;  %v4178_v22 = vld [vmem:[%s6006_s1 + $0x234] ss:$8 sps:$4 sm:$0xff]  }
  0x55   :  { %1497 = vmatprep.subr.bf16.mxu1 %v4088_v23  ;;  %v4173_v23 = vld [vmem:[%s6006_s1 + $0x530] ss:$8 sps:$4 sm:$0xff]  }
  0x57   :  { %842 = vmatpush1.bf16.msra.mxu0 %v4083_v25  ;;  %v4176_v25 = vld [vmem:[%s6006_s1 + $0x230] ss:$8 sps:$4 sm:$0xff]  }
  0x58   :  { %843 = vmatprep.subr.bf16.mxu0 %v4091_v27  ;;  %1498 = vmatpush1.bf16.msra.mxu1 %v4086_v28  ;;  %v4179_v27 = vld [vmem:[%s6006_s1 + $0x540] ss:$8 sps:$4 sm:$0xff]   ;;  %v4187_v28 = vld [vmem:[%s6006_s1 + $0x554] ss:$8 sps:$4 sm:$0xff]  }
  0x59   :  { %1499 = vmatprep.subr.bf16.mxu1 %v4094_v29  ;;  %v4182_v29 = vld [vmem:[%s6006_s1 + $0x240] ss:$8 sps:$4 sm:$0xff]  }
  0x5b   :  { %844 = vmatpush1.bf16.msra.mxu0 %v4089_v30  ;;  %v4190_v30 = vld [vmem:[%s6006_s1 + $0x254] ss:$8 sps:$4 sm:$0xff]  }
  0x5c   :  { %845 = vmatprep.subr.bf16.mxu0 %v4097_v32  ;;  %1500 = vmatpush1.bf16.msra.mxu1 %v4092_v31  ;;  %v4185_v31 = vld [vmem:[%s6006_s1 + $0x550] ss:$8 sps:$4 sm:$0xff]   ;;  %v4193_v32 = vld [vmem:[%s6006_s1 + $0x564] ss:$8 sps:$4 sm:$0xff]  }
  0x5d   :  { %1501 = vmatprep.subr.bf16.mxu1 %v4100_v34  ;;  %v4196_v34 = vld [vmem:[%s6006_s1 + $0x264] ss:$8 sps:$4 sm:$0xff]  }
  0x5f   :  { %846 = vmatpush1.bf16.msra.mxu0 %v4095_v35  ;;  %v4191_v35 = vld [vmem:[%s6006_s1 + $0x560] ss:$8 sps:$4 sm:$0xff]  }
  0x60   :  { %847 = vmatprep.subr.bf16.mxu0 %v4103_v36  ;;  %1502 = vmatpush1.bf16.msra.mxu1 %v4098_v37  ;;  %v4199_v36 = vld [vmem:[%s6006_s1 + $0x574] ss:$8 sps:$4 sm:$0xff]   ;;  %v4194_v37 = vld [vmem:[%s6006_s1 + $0x260] ss:$8 sps:$4 sm:$0xff]  }
  0x61   :  { %1503 = vmatprep.subr.bf16.mxu1 %v4106_v38  ;;  %v4202_v38 = vld [vmem:[%s6006_s1 + $0x274] ss:$8 sps:$4 sm:$0xff]  }
  0x63   :  { %848 = vmatpush1.bf16.msra.mxu0 %v4101_v39  ;;  %v4197_v39 = vld [vmem:[%s6006_s1 + $0x570] ss:$8 sps:$4 sm:$0xff]  }
  0x64   :  { %849 = vmatprep.subr.bf16.mxu0 %v4109_v40  ;;  %1504 = vmatpush1.bf16.msra.mxu1 %v4104_v41  ;;  %v4205_v40 = vld [vmem:[%s6006_s1 + $0x584] ss:$8 sps:$4 sm:$0xff]   ;;  %v4200_v41 = vld [vmem:[%s6006_s1 + $0x270] ss:$8 sps:$4 sm:$0xff]  }
  0x65   :  { %1505 = vmatprep.subr.bf16.mxu1 %v4112_v42  ;;  %v4208_v42 = vld [vmem:[%s6006_s1 + $0x284] ss:$8 sps:$4 sm:$0xff]  }
  0x67   :  { %850 = vmatpush1.bf16.msra.mxu0 %v4107_v43  ;;  %v4203_v43 = vld [vmem:[%s6006_s1 + $0x580] ss:$8 sps:$4 sm:$0xff]  }
  0x68   :  { %851 = vmatprep.subr.bf16.mxu0 %v4115_v44  ;;  %1506 = vmatpush1.bf16.msra.mxu1 %v4110_v45  ;;  %v4211_v44 = vld [vmem:[%s6006_s1 + $0x594] ss:$8 sps:$4 sm:$0xff]   ;;  %v4206_v45 = vld [vmem:[%s6006_s1 + $0x280] ss:$8 sps:$4 sm:$0xff]  }
  0x69   :  { %1507 = vmatprep.subr.bf16.mxu1 %v4118_v46  ;;  %v4214_v46 = vld [vmem:[%s6006_s1 + $0x294] ss:$8 sps:$4 sm:$0xff]  }
  0x6b   :  { %852 = vmatpush1.bf16.msra.mxu0 %v4113_v47  ;;  %v4209_v47 = vld [vmem:[%s6006_s1 + $0x590] ss:$8 sps:$4 sm:$0xff]  }
  0x6c   :  { %853 = vmatprep.subr.bf16.mxu0 %v4121_v48  ;;  %1508 = vmatpush1.bf16.msra.mxu1 %v4116_v49  ;;  %v4217_v48 = vld [vmem:[%s6006_s1 + $0x5a4] ss:$8 sps:$4 sm:$0xff]   ;;  %v4212_v49 = vld [vmem:[%s6006_s1 + $0x290] ss:$8 sps:$4 sm:$0xff]  }
  0x6d   :  { %1509 = vmatprep.subr.bf16.mxu1 %v4124_v50  ;;  %v4220_v50 = vld [vmem:[%s6006_s1 + $0x2a4] ss:$8 sps:$4 sm:$0xff]  }
  0x6f   :  { %854 = vmatpush1.bf16.msra.mxu0 %v4119_v51  ;;  %v4215_v51 = vld [vmem:[%s6006_s1 + $0x5a0] ss:$8 sps:$4 sm:$0xff]  }
  0x70   :  { %855 = vmatprep.subr.bf16.mxu0 %v4127_v52  ;;  %1510 = vmatpush1.bf16.msra.mxu1 %v4122_v53  ;;  %v4223_v52 = vld [vmem:[%s6006_s1 + $0x5b4] ss:$8 sps:$4 sm:$0xff]   ;;  %v4218_v53 = vld [vmem:[%s6006_s1 + $0x2a0] ss:$8 sps:$4 sm:$0xff]  }
  0x71   :  { %1511 = vmatprep.subr.bf16.mxu1 %v4130_v54  ;;  %v4226_v54 = vld [vmem:[%s6006_s1 + $0x2b4] ss:$8 sps:$4 sm:$0xff]  }
  0x73   :  { %856 = vmatpush1.bf16.msra.mxu0 %v4125_v55  ;;  %v4221_v55 = vld [vmem:[%s6006_s1 + $0x5b0] ss:$8 sps:$4 sm:$0xff]  }
  0x74   :  { %857 = vmatprep.subr.bf16.mxu0 %v4133_v56  ;;  %1512 = vmatpush1.bf16.msra.mxu1 %v4128_v57  ;;  %v4224_v56 = vld [vmem:[%s6006_s1 + $0x2b0] ss:$8 sps:$4 sm:$0xff]   ;;  %v4229_v57 = vld [vmem:[%s6006_s1 + $0x5c4] ss:$8 sps:$4 sm:$0xff]  }
  0x75   :  { %1513 = vmatprep.subr.bf16.mxu1 %v4136_v58  ;;  %v4227_v58 = vld [vmem:[%s6006_s1 + $0x5c0] ss:$8 sps:$4 sm:$0xff]  }
  0x77   :  { %858 = vmatpush1.bf16.msra.mxu0 %v4131_v59  ;;  %v4232_v59 = vld [vmem:[%s6006_s1 + $0x2c4] ss:$8 sps:$4 sm:$0xff]  }
  0x78   :  { %859 = vmatprep.subr.bf16.mxu0 %v4141_v60  ;;  %1514 = vmatpush1.bf16.msra.mxu1 %v4134_v61  ;;  %v4230_v60 = vld [vmem:[%s6006_s1 + $0x2c0] ss:$8 sps:$4 sm:$0xff]   ;;  %v4235_v61 = vld [vmem:[%s6006_s1 + $0x5d4] ss:$8 sps:$4 sm:$0xff]  }
  0x79   :  { %1515 = vmatprep.subr.bf16.mxu1 %v4145_v62  ;;  %v4240_v62 = vld [vmem:[%s6006_s1 + $0x2d4] ss:$8 sps:$4 sm:$0xff]  }
  0x7b   :  { %860 = vmatpush1.bf16.msra.mxu0 %v4139_v63  ;;  %v4233_v63 = vld [vmem:[%s6006_s1 + $0x5d0] ss:$8 sps:$4 sm:$0xff]  }
  0x7c   :  { %861 = vmatprep.subr.bf16.mxu0 %v4148_v0  ;;  %1516 = vmatpush1.bf16.msra.mxu1 %v4143_v1  ;;  %v4238_v0 = vld [vmem:[%s6006_s1 + $0x2d0] ss:$8 sps:$4 sm:$0xff]   ;;  %v4244_v1 = vld [vmem:[%s6006_s1 + $0x5e4] ss:$8 sps:$4 sm:$0xff]  }
  0x7d   :  { %1517 = vmatprep.subr.bf16.mxu1 %v4151_v2  ;;  %v4247_v2 = vld [vmem:[%s6006_s1 + $0x2e4] ss:$8 sps:$4 sm:$0xff]  }
  0x7f   :  { %862 = vmatpush1.bf16.msra.mxu0 %v4146_v3  ;;  %v4242_v3 = vld [vmem:[%s6006_s1 + $0x5e0] ss:$8 sps:$4 sm:$0xff]  }
  0x80   :  { %884 = vmatprep.subr.bf16.mxu0 %v4157_v5  ;;  %1518 = vmatpush1.bf16.msra.mxu1 %v4149_v4  ;;  %v4245_v4 = vld [vmem:[%s6006_s1 + $0x2e0] ss:$8 sps:$4 sm:$0xff]   ;;  %v4250_v5 = vld [vmem:[%s6006_s1 + $0x5f4] ss:$8 sps:$4 sm:$0xff]  }
  0x81   :  { %1540 = vmatprep.subr.bf16.mxu1 %v4160_v7  ;;  %v4256_v7 = vld [vmem:[%s6006_s1 + $0x2f4] ss:$8 sps:$4 sm:$0xff]  }
  0x82   :  { %864 = vmatmul.mubr.bf16.vlgmr.msra.gmra.mrb[0].mxu0 %v4989_v6 }
  0x83   :  { %885 = vmatpush1.bf16.msra.mxu0 %v4155_v8  ;;  %873 = vmatprep.mubr.bf16.mxu0 %v5000_v9  ;;  %v4248_v8 = vld [vmem:[%s6006_s1 + $0x5f0] ss:$8 sps:$4 sm:$0xff]  }
  0x84   :  { %886 = vmatprep.subr.bf16.mxu0 %v4163_v10  ;;  %1520 = vmatmul.mubr.bf16.vlgmr.msra.gmra.mrb[0].mxu1 %v4989_v6  ;;  %v4254_v10 = vld [vmem:[%s6006_s1 + $0x2f0] ss:$8 sps:$4 sm:$0xff]  }
  0x85   :  { %1541 = vmatpush1.bf16.msra.mxu1 %v4158_v11  ;;  %1529 = vmatprep.mubr.bf16.mxu1 %v5000_v9  ;;  %v4259_v11 = vld [vmem:[%s6006_s1 + $0x604] ss:$8 sps:$4 sm:$0xff]  }
  0x86   :  { %1542 = vmatprep.subr.bf16.mxu1 %v4166_v12  ;;  %v5209_v12 = vld [vmem:[%s6005_s0 + $0x10] ss:$24 sps:$4 sm:$0xff]  }
  0x87   :  { %887 = vmatpush1.bf16.msra.mxu0 %v4161_v13  ;;  %v4257_v13 = vld [vmem:[%s6006_s1 + $0x600] ss:$8 sps:$4 sm:$0xff]  }
  0x88   :  { %888 = vmatprep.subr.bf16.mxu0 %v4169_v14  ;;  %v4262_v14 = vld [vmem:[%s6006_s1 + $0x614] ss:$8 sps:$4 sm:$0xff]  }
  0x89   :  { %1543 = vmatpush1.bf16.msra.mxu1 %v4164_v15  ;;  %v5220_v15 = vld [vmem:[%s6005_s0 + $0x44] ss:$24 sps:$4 sm:$0xff]  }
  0x8a   :  { %1544 = vmatprep.subr.bf16.mxu1 %v4172_v16  ;;  %874 = vmatmul.mubr.bf16.gmra.mrb[4].mxu0 %v5030_v17  ;;  %v4260_v16 = vld [vmem:[%s6006_s1 + $0x610] ss:$8 sps:$4 sm:$0xff]  }
  0x8b   :  { %889 = vmatpush1.bf16.msra.mxu0 %v4167_v18  ;;  %916 = vmatprep.mubr.bf16.mxu0 %v5038_v19  ;;  %v4268_v18 = vld [vmem:[%s6006_s1 + $0x624] ss:$8 sps:$4 sm:$0xff]  }
  0x8c   :  { %890 = vmatprep.subr.bf16.mxu0 %v4175_v20  ;;  %1530 = vmatmul.mubr.bf16.gmra.mrb[4].mxu1 %v5030_v17  ;;  %v5234_v20 = vld [vmem:[%s6005_s0 + $0x40] ss:$24 sps:$4 sm:$0xff]  }
  0x8d   :  { %1545 = vmatpush1.bf16.msra.mxu1 %v4170_v21  ;;  %1572 = vmatprep.mubr.bf16.mxu1 %v5038_v19  ;;  %v4266_v21 = vld [vmem:[%s6006_s1 + $0x620] ss:$8 sps:$4 sm:$0xff]  }
  0x8e   :  { %1546 = vmatprep.subr.bf16.mxu1 %v4178_v22  ;;  %v4271_v22 = vld [vmem:[%s6006_s1 + $0x634] ss:$8 sps:$4 sm:$0xff]  }
  0x8f   :  { %891 = vmatpush1.bf16.msra.mxu0 %v4173_v23  ;;  %v4269_v23 = vld [vmem:[%s6006_s1 + $0x630] ss:$8 sps:$4 sm:$0xff]  }
  0x90   :  { %892 = vmatprep.subr.bf16.mxu0 %v4181_v24  ;;  %v4274_v24 = vld [vmem:[%s6006_s1 + $0x644] ss:$8 sps:$4 sm:$0xff]  }
  0x91   :  { %1547 = vmatpush1.bf16.msra.mxu1 %v4176_v25  ;;  %v4512_v25 = vld [vmem:[%s6005_s0 + $0x4] ss:$24 sps:$4 sm:$0xff]  }
  0x92   :  { %1548 = vmatprep.subr.bf16.mxu1 %v4184_v26  ;;  %v4272_v26 = vld [vmem:[%s6006_s1 + $0x640] ss:$8 sps:$4 sm:$0xff]  }
  0x93   :  { %893 = vmatpush1.bf16.msra.mxu0 %v4179_v27  ;;  %v4277_v27 = vld [vmem:[%s6006_s1 + $0x654] ss:$8 sps:$4 sm:$0xff]  }
  0x94   :  { %894 = vmatprep.subr.bf16.mxu0 %v4187_v28  ;;  %v4275_v28 = vld [vmem:[%s6006_s1 + $0x650] ss:$8 sps:$4 sm:$0xff]  }
  0x95   :  { %1549 = vmatpush1.bf16.msra.mxu1 %v4182_v29  ;;  %v4280_v29 = vld [vmem:[%s6006_s1 + $0x664] ss:$8 sps:$4 sm:$0xff]  }
  0x96   :  { %1550 = vmatprep.subr.bf16.mxu1 %v4190_v30  ;;  %v4278_v30 = vld [vmem:[%s6006_s1 + $0x660] ss:$8 sps:$4 sm:$0xff]  }
  0x97   :  { %895 = vmatpush1.bf16.msra.mxu0 %v4185_v31  ;;  %v4283_v31 = vld [vmem:[%s6006_s1 + $0x674] ss:$8 sps:$4 sm:$0xff]  }
  0x98   :  { %896 = vmatprep.subr.bf16.mxu0 %v4193_v32 }
  0x99   :  { %1551 = vmatpush1.bf16.msra.mxu1 %v4188_v33 }
  0x9a   :  { %1552 = vmatprep.subr.bf16.mxu1 %v4196_v34 }
  0x9b   :  { %897 = vmatpush1.bf16.msra.mxu0 %v4191_v35 }
  0x9c   :  { %898 = vmatprep.subr.bf16.mxu0 %v4199_v36 }
  0x9d   :  { %1553 = vmatpush1.bf16.msra.mxu1 %v4194_v37 }
  0x9e   :  { %1554 = vmatprep.subr.bf16.mxu1 %v4202_v38 }
  0x9f   :  { %899 = vmatpush1.bf16.msra.mxu0 %v4197_v39 }
  0xa0   :  { %900 = vmatprep.subr.bf16.mxu0 %v4205_v40 }
  0xa1   :  { %1555 = vmatpush1.bf16.msra.mxu1 %v4200_v41 }
  0xa2   :  { %1556 = vmatprep.subr.bf16.mxu1 %v4208_v42 }
  0xa3   :  { %901 = vmatpush1.bf16.msra.mxu0 %v4203_v43 }
  0xa4   :  { %902 = vmatprep.subr.bf16.mxu0 %v4211_v44 }
  0xa5   :  { %1557 = vmatpush1.bf16.msra.mxu1 %v4206_v45 }
  0xa6   :  { %1558 = vmatprep.subr.bf16.mxu1 %v4214_v46 }
  0xa7   :  { %903 = vmatpush1.bf16.msra.mxu0 %v4209_v47 }
  0xa8   :  { %904 = vmatprep.subr.bf16.mxu0 %v4217_v48 }
  0xa9   :  { %1559 = vmatpush1.bf16.msra.mxu1 %v4212_v49 }
  0xaa   :  { %1560 = vmatprep.subr.bf16.mxu1 %v4220_v50 }
  0xab   :  { %905 = vmatpush1.bf16.msra.mxu0 %v4215_v51 }
  0xac   :  { %906 = vmatprep.subr.bf16.mxu0 %v4223_v52 }
  0xad   :  { %1561 = vmatpush1.bf16.msra.mxu1 %v4218_v53 }
  0xae   :  { %1562 = vmatprep.subr.bf16.mxu1 %v4226_v54 }
  0xaf   :  { %907 = vmatpush1.bf16.msra.mxu0 %v4221_v55 }
  0xb0   :  { %908 = vmatprep.subr.bf16.mxu0 %v4229_v57 }
  0xb1   :  { %1563 = vmatpush1.bf16.msra.mxu1 %v4224_v56 }
  0xb2   :  { %1564 = vmatprep.subr.bf16.mxu1 %v4232_v59 }
  0xb3   :  { %909 = vmatpush1.bf16.msra.mxu0 %v4227_v58 }
  0xb4   :  { %910 = vmatprep.subr.bf16.mxu0 %v4235_v61 }
  0xb5   :  { %1565 = vmatpush1.bf16.msra.mxu1 %v4230_v60 }
  0xb6   :  { %1566 = vmatprep.subr.bf16.mxu1 %v4240_v62 }
  0xb7   :  { %911 = vmatpush1.bf16.msra.mxu0 %v4233_v63 }
  0xb8   :  { %912 = vmatprep.subr.bf16.mxu0 %v4244_v1 }
  0xb9   :  { %1567 = vmatpush1.bf16.msra.mxu1 %v4238_v0 }
  0xba   :  { %1568 = vmatprep.subr.bf16.mxu1 %v4247_v2 }
  0xbb   :  { %913 = vmatpush1.bf16.msra.mxu0 %v4242_v3 }
  0xbc   :  { %914 = vmatprep.subr.bf16.mxu0 %v4250_v5 }
  0xbd   :  { %1569 = vmatpush1.bf16.msra.mxu1 %v4245_v4 }
  0xbe   :  { %1570 = vmatprep.subr.bf16.mxu1 %v4256_v7 }
  0xbf   :  { %915 = vmatpush1.bf16.msra.mxu0 %v4248_v8 }
  0xc0   :  { %2170 = vmatprep.subr.bf16.mxu0 %v4259_v11 }
  0xc1   :  { %1571 = vmatpush1.bf16.msra.mxu1 %v4254_v10 }
  0xc2   :  { %917 = vmatmul.mubr.bf16.vlgmr.msra.gmra.mrb[0].mxu0 %v5209_v12 }
  0xc3   :  { %2171 = vmatpush1.bf16.msra.mxu0 %v4257_v13  ;;  %926 = vmatprep.mubr.bf16.mxu0 %v5220_v15 }
  0xc4   :  { %1573 = vmatmul.mubr.bf16.vlgmr.msra.gmra.mrb[0].mxu1 %v5209_v12  ;;  %2172 = vmatprep.subr.bf16.mxu0 %v4262_v14 }
  0xc5   :  { %1582 = vmatprep.mubr.bf16.mxu1 %v5220_v15 }
  0xc7   :  { %2173 = vmatpush1.bf16.msra.mxu0 %v4260_v16 }
  0xc8   :  { %2174 = vmatprep.subr.bf16.mxu0 %v4268_v18 }
  0xca   :  { %927 = vmatmul.mubr.bf16.gmra.mrb[4].mxu0 %v5234_v20 }
  0xcb   :  { %2175 = vmatpush1.bf16.msra.mxu0 %v4266_v21  ;;  %2202 = vmatprep.mubr.bf16.mxu0 %v4512_v25 }
  0xcc   :  { %1583 = vmatmul.mubr.bf16.gmra.mrb[4].mxu1 %v5234_v20  ;;  %2176 = vmatprep.subr.bf16.mxu0 %v4271_v22 }
  0xcf   :  { %2177 = vmatpush1.bf16.msra.mxu0 %v4269_v23 }
  0xd0   :  { %2178 = vmatprep.subr.bf16.mxu0 %v4274_v24 }
  0xd3   :  { %2179 = vmatpush1.bf16.msra.mxu0 %v4272_v26 }
  0xd4   :  { %2180 = vmatprep.subr.bf16.mxu0 %v4277_v27 }
  0xd7   :  { %2181 = vmatpush1.bf16.msra.mxu0 %v4275_v28 }
  0xd8   :  { %2182 = vmatprep.subr.bf16.mxu0 %v4280_v29 }
  0xd9   :  { %12 = vsyncpa [#allocation3], 0  ;;  %v4281_v32 = vld [vmem:[%s6006_s1 + $0x670] ss:$8 sps:$4 sm:$0xff]   ;;  %v4286_v33 = vld [vmem:[%s6006_s1 + $0x684] ss:$8 sps:$4 sm:$0xff]  }
  0xda   :  { %v4284_v34 = vld [vmem:[%s6006_s1 + $0x680] ss:$8 sps:$4 sm:$0xff]   ;;  %v4289_v35 = vld [vmem:[%s6006_s1 + $0x694] ss:$8 sps:$4 sm:$0xff]   ;;  %v4287_v36 = vld [vmem:[%s6006_s1 + $0x690] ss:$8 sps:$4 sm:$0xff]  }
  0xdb   :  { %2183 = vmatpush1.bf16.msra.mxu0 %v4278_v30  ;;  %v4292_v37 = vld [vmem:[%s6006_s1 + $0x6a4] ss:$8 sps:$4 sm:$0xff]   ;;  %v4290_v38 = vld [vmem:[%s6006_s1 + $0x6a0] ss:$8 sps:$4 sm:$0xff]   ;;  %v4295_v39 = vld [vmem:[%s6006_s1 + $0x6b4] ss:$8 sps:$4 sm:$0xff]  }
  0xdc   :  { %2184 = vmatprep.subr.bf16.mxu0 %v4283_v31  ;;  %v4293_v40 = vld [vmem:[%s6006_s1 + $0x6b0] ss:$8 sps:$4 sm:$0xff]   ;;  %v4298_v41 = vld [vmem:[%s6006_s1 + $0x6c4] ss:$8 sps:$4 sm:$0xff]   ;;  %v4296_v42 = vld [vmem:[%s6006_s1 + $0x6c0] ss:$8 sps:$4 sm:$0xff]  }
  0xdd   :  { %v4301_v43 = vld [vmem:[%s6006_s1 + $0x6d4] ss:$8 sps:$4 sm:$0xff]   ;;  %v4299_v44 = vld [vmem:[%s6006_s1 + $0x6d0] ss:$8 sps:$4 sm:$0xff]   ;;  %v4304_v45 = vld [vmem:[%s6006_s1 + $0x6e4] ss:$8 sps:$4 sm:$0xff]  }
  0xde   :  { %v4302_v46 = vld [vmem:[%s6006_s1 + $0x6e0] ss:$8 sps:$4 sm:$0xff]   ;;  %v4307_v47 = vld [vmem:[%s6006_s1 + $0x6f4] ss:$8 sps:$4 sm:$0xff]   ;;  %v4305_v48 = vld [vmem:[%s6006_s1 + $0x6f0] ss:$8 sps:$4 sm:$0xff]  }
  0xdf   :  { %2185 = vmatpush1.bf16.msra.mxu0 %v4281_v32  ;;  %v4310_v49 = vld [vmem:[%s6006_s1 + $0x704] ss:$8 sps:$4 sm:$0xff]   ;;  %v4308_v50 = vld [vmem:[%s6006_s1 + $0x700] ss:$8 sps:$4 sm:$0xff]   ;;  %v4313_v51 = vld [vmem:[%s6006_s1 + $0x714] ss:$8 sps:$4 sm:$0xff]  }
  0xe0   :  { %2186 = vmatprep.subr.bf16.mxu0 %v4286_v33  ;;  %v4513_v52 = vld [vmem:[%s6005_s0] ss:$24 sps:$4 sm:$0xff]   ;;  %v4514_v54 = vld [vmem:[%s6005_s0 + $0x34] ss:$24 sps:$4 sm:$0xff]   ;;  %v4515_v58 = vld [vmem:[%s6005_s0 + $0x30] ss:$24 sps:$4 sm:$0xff]  }
  0xe1   :  { %v4311_v53 = vld [vmem:[%s6006_s1 + $0x710] ss:$8 sps:$4 sm:$0xff]   ;;  %v4316_v55 = vld [vmem:[%s6006_s1 + $0x724] ss:$8 sps:$4 sm:$0xff]   ;;  %v4314_v56 = vld [vmem:[%s6006_s1 + $0x720] ss:$8 sps:$4 sm:$0xff]  }
  0xe2   :  { %v4319_v57 = vld [vmem:[%s6006_s1 + $0x734] ss:$8 sps:$4 sm:$0xff]   ;;  %v4317_v59 = vld [vmem:[%s6006_s1 + $0x730] ss:$8 sps:$4 sm:$0xff]   ;;  %v4516_v60 = vld [vmem:[%s6005_s0 + $0xc] ss:$24 sps:$4 sm:$0xff]  }
  0xe3   :  { %2187 = vmatpush1.bf16.msra.mxu0 %v4284_v34  ;;  %v4322_v61 = vld [vmem:[%s6006_s1 + $0x744] ss:$8 sps:$4 sm:$0xff]   ;;  %v4320_v62 = vld [vmem:[%s6006_s1 + $0x740] ss:$8 sps:$4 sm:$0xff]   ;;  %v4325_v63 = vld [vmem:[%s6006_s1 + $0x754] ss:$8 sps:$4 sm:$0xff]  }
  0xe4   :  { %2188 = vmatprep.subr.bf16.mxu0 %v4289_v35  ;;  %v4323_v0 = vld [vmem:[%s6006_s1 + $0x750] ss:$8 sps:$4 sm:$0xff]   ;;  %v4328_v1 = vld [vmem:[%s6006_s1 + $0x764] ss:$8 sps:$4 sm:$0xff]   ;;  %v4326_v2 = vld [vmem:[%s6006_s1 + $0x760] ss:$8 sps:$4 sm:$0xff]  }
  0xe5   :  { %v4331_v3 = vld [vmem:[%s6006_s1 + $0x774] ss:$8 sps:$4 sm:$0xff]   ;;  %v4329_v4 = vld [vmem:[%s6006_s1 + $0x770] ss:$8 sps:$4 sm:$0xff]   ;;  %v4334_v5 = vld [vmem:[%s6006_s1 + $0x784] ss:$8 sps:$4 sm:$0xff]  }
  0xe6   :  { %v4332_v7 = vld [vmem:[%s6006_s1 + $0x780] ss:$8 sps:$4 sm:$0xff]   ;;  %v4337_v8 = vld [vmem:[%s6006_s1 + $0x794] ss:$8 sps:$4 sm:$0xff]   ;;  %v4335_v10 = vld [vmem:[%s6006_s1 + $0x790] ss:$8 sps:$4 sm:$0xff]  }
  0xe7   :  { %2189 = vmatpush1.bf16.msra.mxu0 %v4287_v36  ;;  %v4340_v11 = vld [vmem:[%s6006_s1 + $0x7a4] ss:$8 sps:$4 sm:$0xff]   ;;  %v4404_v13 = vld [vmem:[%s6008_s3] ss:$8 sps:$4 sm:$0xff]   ;;  %v4409_v16 = vld [vmem:[%s6008_s3 + $0x14] ss:$8 sps:$4 sm:$0xff]  }
  0xe8   :  { %2190 = vmatprep.subr.bf16.mxu0 %v4292_v37  ;;  %v4406_v14 = vld [vmem:[%s6008_s3 + $0x4] ss:$8 sps:$4 sm:$0xff]   ;;  %v4338_v18 = vld [vmem:[%s6006_s1 + $0x7a0] ss:$8 sps:$4 sm:$0xff]   ;;  %v4407_v21 = vld [vmem:[%s6008_s3 + $0x10] ss:$8 sps:$4 sm:$0xff]  }
  0xe9   :  { %2537 = vmatprep.subr.bf16.mxu1 %v4406_v14  ;;  %v4343_v22 = vld [vmem:[%s6006_s1 + $0x7b4] ss:$8 sps:$4 sm:$0xff]   ;;  %v4412_v23 = vld [vmem:[%s6008_s3 + $0x24] ss:$8 sps:$4 sm:$0xff]   ;;  %v4341_v24 = vld [vmem:[%s6006_s1 + $0x7b0] ss:$8 sps:$4 sm:$0xff]  }
  0xea   :  { %2538 = vmatpush1.bf16.msra.mxu1 %v4404_v13  ;;  %v4410_v25 = vld [vmem:[%s6008_s3 + $0x20] ss:$8 sps:$4 sm:$0xff]   ;;  %v4346_v26 = vld [vmem:[%s6006_s1 + $0x7c4] ss:$8 sps:$4 sm:$0xff]   ;;  %v4415_v27 = vld [vmem:[%s6008_s3 + $0x34] ss:$8 sps:$4 sm:$0xff]  }
  0xeb   :  { %2191 = vmatpush1.bf16.msra.mxu0 %v4290_v38  ;;  %2539 = vmatprep.subr.bf16.mxu1 %v4409_v16  ;;  %v4344_v28 = vld [vmem:[%s6006_s1 + $0x7c0] ss:$8 sps:$4 sm:$0xff]   ;;  %v4413_v29 = vld [vmem:[%s6008_s3 + $0x30] ss:$8 sps:$4 sm:$0xff]   ;;  %v4349_v30 = vld [vmem:[%s6006_s1 + $0x7d4] ss:$8 sps:$4 sm:$0xff]  }
  0xec   :  { %2192 = vmatprep.subr.bf16.mxu0 %v4295_v39  ;;  %v4418_v31 = vld [vmem:[%s6008_s3 + $0x44] ss:$8 sps:$4 sm:$0xff]   ;;  %v4347_v32 = vld [vmem:[%s6006_s1 + $0x7d0] ss:$8 sps:$4 sm:$0xff]   ;;  %v4416_v33 = vld [vmem:[%s6008_s3 + $0x40] ss:$8 sps:$4 sm:$0xff]  }
  0xed   :  { %v4352_v34 = vld [vmem:[%s6006_s1 + $0x7e4] ss:$8 sps:$4 sm:$0xff]   ;;  %v4421_v35 = vld [vmem:[%s6008_s3 + $0x54] ss:$8 sps:$4 sm:$0xff]   ;;  %v4350_v36 = vld [vmem:[%s6006_s1 + $0x7e0] ss:$8 sps:$4 sm:$0xff]  }
  0xee   :  { %2540 = vmatpush1.bf16.msra.mxu1 %v4407_v21  ;;  %v4419_v37 = vld [vmem:[%s6008_s3 + $0x50] ss:$8 sps:$4 sm:$0xff]   ;;  %v4355_v38 = vld [vmem:[%s6006_s1 + $0x7f4] ss:$8 sps:$4 sm:$0xff]   ;;  %v4424_v39 = vld [vmem:[%s6008_s3 + $0x64] ss:$8 sps:$4 sm:$0xff]  }
  0xef   :  { %2193 = vmatpush1.bf16.msra.mxu0 %v4293_v40  ;;  %2541 = vmatprep.subr.bf16.mxu1 %v4412_v23  ;;  %v4353_v40 = vld [vmem:[%s6006_s1 + $0x7f0] ss:$8 sps:$4 sm:$0xff]   ;;  %vm2530_vm3 = vcmask 523264   ;;  %vm4541_vm4 = vmmov 1   ;;  %vm3130_vm7 = vcmask 1041409   ;;  %s4543_s21 = smov [#allocation2]  }
  0xf0   :  { %2194 = vmatprep.subr.bf16.mxu0 %v4298_v41  ;;  %v4422_v41 = vld [vmem:[%s6008_s3 + $0x60] ss:$8 sps:$4 sm:$0xff]   ;;  %s3213_s22 = sshll.u32 %s4543_s21, 4  ;;  %s3214_s22 = int_to_ptr.vmem [resolvable:$true] %s3213_s22 }
  0xf1   :  { %s4517_s23 = scalar_lea.vmem %s3214_s22, 32  ;;  %p4522_p1 = scmp.lt.s32.totalorder %s3214_s22, %s3214_s22 }
  0xf2   :  { %2542 = vmatpush1.bf16.msra.mxu1 %v4410_v25  ;;  %p4518_p0 = scmp.ne.s32.totalorder %s3214_s22, %s4517_s23  ;;  %p4523_p2 = scmp.lt.s32.totalorder %s4517_s23, %s4517_s23 }
  0xf3   :  { %2195 = vmatpush1.bf16.msra.mxu0 %v4296_v42  ;;  %2543 = vmatprep.subr.bf16.mxu1 %v4415_v27  ;;  %v4358_v42 = vld [vmem:[%s6006_s1 + $0x804] ss:$8 sps:$4 sm:$0xff]  }
  0xf4   :  { %2196 = vmatprep.subr.bf16.mxu0 %v4301_v43  ;;  %v4356_v43 = vld [vmem:[%s6006_s1 + $0x800] ss:$8 sps:$4 sm:$0xff]   ;;  %p4524_p3 = por %p4523_p2, %p4522_p1 }
  0xf6   :  { %2544 = vmatpush1.bf16.msra.mxu1 %v4413_v29  ;;  %p4525_p4 = pnand %p4524_p3, %p4518_p0 }
  0xf7   :  { %2197 = vmatpush1.bf16.msra.mxu0 %v4299_v44  ;;  %2545 = vmatprep.subr.bf16.mxu1 %v4418_v31  ;;  %v4361_v44 = vld [vmem:[%s6006_s1 + $0x814] ss:$8 sps:$4 sm:$0xff]  }
  0xf8   :  { %2198 = vmatprep.subr.bf16.mxu0 %v4304_v45  ;;  %v4359_v45 = vld [vmem:[%s6006_s1 + $0x810] ss:$8 sps:$4 sm:$0xff]  }
  0xfa   :  { %2546 = vmatpush1.bf16.msra.mxu1 %v4416_v33 }
  0xfb   :  { %2199 = vmatpush1.bf16.msra.mxu0 %v4302_v46  ;;  %2547 = vmatprep.subr.bf16.mxu1 %v4421_v35  ;;  %v4364_v46 = vld [vmem:[%s6006_s1 + $0x824] ss:$8 sps:$4 sm:$0xff]  }
  0xfc   :  { %2200 = vmatprep.subr.bf16.mxu0 %v4307_v47  ;;  %v4362_v47 = vld [vmem:[%s6006_s1 + $0x820] ss:$8 sps:$4 sm:$0xff]  }
  0xfe   :  { %2548 = vmatpush1.bf16.msra.mxu1 %v4419_v37 }
  0xff   :  { %2201 = vmatpush1.bf16.msra.mxu0 %v4305_v48  ;;  %2549 = vmatprep.subr.bf16.mxu1 %v4424_v39  ;;  %v4370_v48 = vld [vmem:[%s6006_s1 + $0x844] ss:$8 sps:$4 sm:$0xff]  }
 0x100   :  { %2223 = vmatprep.subr.bf16.mxu0 %v4310_v49  ;;  %v4368_v49 = vld [vmem:[%s6006_s1 + $0x840] ss:$8 sps:$4 sm:$0xff]  }
 0x102   :  { %2203 = vmatmul.mubr.bf16.vlgmr.msra.gmra.mrb[8].mxu0 %v4513_v52  ;;  %2550 = vmatpush1.bf16.msra.mxu1 %v4422_v41  ;;  %v4379_v52 = vld [vmem:[%s6006_s1 + $0x874] ss:$8 sps:$4 sm:$0xff]  }
 0x103   :  { %2224 = vmatpush1.bf16.msra.mxu0 %v4308_v50  ;;  %2212 = vmatprep.mubr.bf16.mxu0 %v4514_v54  ;;  %v4376_v50 = vld [vmem:[%s6006_s1 + $0x864] ss:$8 sps:$4 sm:$0xff]  }
 0x104   :  { %2225 = vmatprep.subr.bf16.mxu0 %v4313_v51  ;;  %v4374_v51 = vld [vmem:[%s6006_s1 + $0x860] ss:$8 sps:$4 sm:$0xff]   ;;  %v4382_v54 = vld [vmem:[%s6006_s1 + $0x884] ss:$8 sps:$4 sm:$0xff]  }
 0x107   :  { %2226 = vmatpush1.bf16.msra.mxu0 %v4311_v53  ;;  %v4377_v53 = vld [vmem:[%s6006_s1 + $0x870] ss:$8 sps:$4 sm:$0xff]  }
 0x108   :  { %2227 = vmatprep.subr.bf16.mxu0 %v4316_v55  ;;  %v4380_v55 = vld [vmem:[%s6006_s1 + $0x880] ss:$8 sps:$4 sm:$0xff]  }
 0x10a   :  { %2213 = vmatmul.mubr.bf16.gmra.mrb[12].mxu0 %v4515_v58  ;;  %v4388_v58 = vld [vmem:[%s6006_s1 + $0x8a4] ss:$8 sps:$4 sm:$0xff]  }
 0x10b   :  { %2228 = vmatpush1.bf16.msra.mxu0 %v4314_v56  ;;  %2255 = vmatprep.mubr.bf16.mxu0 %v4516_v60  ;;  %v4385_v56 = vld [vmem:[%s6006_s1 + $0x894] ss:$8 sps:$4 sm:$0xff]  }
 0x10c   :  { %2229 = vmatprep.subr.bf16.mxu0 %v4319_v57  ;;  %v4383_v57 = vld [vmem:[%s6006_s1 + $0x890] ss:$8 sps:$4 sm:$0xff]   ;;  %v4391_v60 = vld [vmem:[%s6006_s1 + $0x8b4] ss:$8 sps:$4 sm:$0xff]  }
 0x10f   :  { %2230 = vmatpush1.bf16.msra.mxu0 %v4317_v59  ;;  %v4386_v59 = vld [vmem:[%s6006_s1 + $0x8a0] ss:$8 sps:$4 sm:$0xff]  }
 0x110   :  { %2231 = vmatprep.subr.bf16.mxu0 %v4322_v61  ;;  %v4389_v61 = vld [vmem:[%s6006_s1 + $0x8b0] ss:$8 sps:$4 sm:$0xff]  }
 0x113   :  { %2232 = vmatpush1.bf16.msra.mxu0 %v4320_v62  ;;  %v4394_v62 = vld [vmem:[%s6006_s1 + $0x8c4] ss:$8 sps:$4 sm:$0xff]  }
 0x114   :  { %2233 = vmatprep.subr.bf16.mxu0 %v4325_v63  ;;  %v4392_v63 = vld [vmem:[%s6006_s1 + $0x8c0] ss:$8 sps:$4 sm:$0xff]  }
 0x117   :  { %2234 = vmatpush1.bf16.msra.mxu0 %v4323_v0  ;;  %v4397_v0 = vld [vmem:[%s6006_s1 + $0x8d4] ss:$8 sps:$4 sm:$0xff]  }
 0x118   :  { %2235 = vmatprep.subr.bf16.mxu0 %v4328_v1  ;;  %v4395_v1 = vld [vmem:[%s6006_s1 + $0x8d0] ss:$8 sps:$4 sm:$0xff]  }
 0x11b   :  { %2236 = vmatpush1.bf16.msra.mxu0 %v4326_v2  ;;  %v4400_v2 = vld [vmem:[%s6006_s1 + $0x8e4] ss:$8 sps:$4 sm:$0xff]  }
 0x11c   :  { %2237 = vmatprep.subr.bf16.mxu0 %v4331_v3  ;;  %v4398_v3 = vld [vmem:[%s6006_s1 + $0x8e0] ss:$8 sps:$4 sm:$0xff]  }
 0x11f   :  { %2238 = vmatpush1.bf16.msra.mxu0 %v4329_v4  ;;  %v4403_v4 = vld [vmem:[%s6006_s1 + $0x8f4] ss:$8 sps:$4 sm:$0xff]  }
 0x120   :  { %2239 = vmatprep.subr.bf16.mxu0 %v4334_v5  ;;  %v4401_v5 = vld [vmem:[%s6006_s1 + $0x8f0] ss:$8 sps:$4 sm:$0xff]  }
 0x123   :  { %2240 = vmatpush1.bf16.msra.mxu0 %v4332_v7  ;;  %v40_v7 = vlaneseq }
 0x124   :  { %2241 = vmatprep.subr.bf16.mxu0 %v4337_v8 }
 0x125   :  { %v5576_v8 = vshrl.u32 %v40_v7, 7  ;;  %v2354_v7 = vld [vmem:[%s6007_s2] sm:$0x3] }
 0x127   :  { %2242 = vmatpush1.bf16.msra.mxu0 %v4335_v10  ;;  %vm945_vm0 = vcmp.lt.s32.totalorder %v5576_v8, 7  ;;  %vm2337_vm1 = vcmp.lt.s32.totalorder %v5576_v8, 6  ;;  %vm2994_vm6 = vcmp.lt.s32.totalorder %v5576_v8, 1 }
 0x128   :  { %2243 = vmatprep.subr.bf16.mxu0 %v4340_v11 }
 0x12b   :  { %2244 = vmatpush1.bf16.msra.mxu0 %v4338_v18 }
 0x12c   :  { %2245 = vmatprep.subr.bf16.mxu0 %v4343_v22 }
 0x12f   :  { %2246 = vmatpush1.bf16.msra.mxu0 %v4341_v24 }
 0x130   :  { %2247 = vmatprep.subr.bf16.mxu0 %v4346_v26 }
 0x133   :  { %2248 = vmatpush1.bf16.msra.mxu0 %v4344_v28 }
 0x134   :  { %2249 = vmatprep.subr.bf16.mxu0 %v4349_v30 }
 0x137   :  { %2250 = vmatpush1.bf16.msra.mxu0 %v4347_v32 }
 0x138   :  { %2251 = vmatprep.subr.bf16.mxu0 %v4352_v34 }
 0x13b   :  { %2252 = vmatpush1.bf16.msra.mxu0 %v4350_v36 }
 0x13c   :  { %2253 = vmatprep.subr.bf16.mxu0 %v4355_v38 }
 0x13f   :  { %2254 = vmatpush1.bf16.msra.mxu0 %v4353_v40 }
 0x140   :  { %2276 = vmatprep.subr.bf16.mxu0 %v4358_v42 }
 0x142   :  { %2256 = vmatmul.mubr.bf16.vlgmr.msra.gmra.mrb[8].mxu0 %v4989_v6  ;;  %v4367_v6 = vld [vmem:[%s6006_s1 + $0x834] ss:$8 sps:$4 sm:$0xff]  }
 0x143   :  { %2277 = vmatpush1.bf16.msra.mxu0 %v4356_v43  ;;  %2265 = vmatprep.mubr.bf16.mxu0 %v5000_v9  ;;  %v4365_v9 = vld [vmem:[%s6006_s1 + $0x830] ss:$8 sps:$4 sm:$0xff]  }
 0x144   :  { %2278 = vmatprep.subr.bf16.mxu0 %v4361_v44 }
 0x147   :  { %2279 = vmatpush1.bf16.msra.mxu0 %v4359_v45 }
 0x148   :  { %2280 = vmatprep.subr.bf16.mxu0 %v4364_v46 }
 0x14a   :  { %2266 = vmatmul.mubr.bf16.gmra.mrb[12].mxu0 %v5030_v17  ;;  %v4373_v17 = vld [vmem:[%s6006_s1 + $0x854] ss:$8 sps:$4 sm:$0xff]  }
 0x14b   :  { %2281 = vmatpush1.bf16.msra.mxu0 %v4362_v47  ;;  %2308 = vmatprep.mubr.bf16.mxu0 %v5038_v19  ;;  %v4371_v19 = vld [vmem:[%s6006_s1 + $0x850] ss:$8 sps:$4 sm:$0xff]  }
 0x14c   :  { %2282 = vmatprep.subr.bf16.mxu0 %v4367_v6 }
 0x14f   :  { %2283 = vmatpush1.bf16.msra.mxu0 %v4365_v9 }
 0x150   :  { %2284 = vmatprep.subr.bf16.mxu0 %v4370_v48 }
 0x153   :  { %2285 = vmatpush1.bf16.msra.mxu0 %v4368_v49 }
 0x154   :  { %2286 = vmatprep.subr.bf16.mxu0 %v4373_v17  ;;  %v4427_v17 = vld [vmem:[%s6008_s3 + $0x74] ss:$8 sps:$4 sm:$0xff]  }
 0x155   :  { %2551 = vmatprep.subr.bf16.mxu1 %v4427_v17  ;;  %v4445_v17 = vld [vmem:[%s6008_s3 + $0xd4] ss:$8 sps:$4 sm:$0xff]  }
 0x157   :  { %2287 = vmatpush1.bf16.msra.mxu0 %v4371_v19  ;;  %v4425_v19 = vld [vmem:[%s6008_s3 + $0x70] ss:$8 sps:$4 sm:$0xff]  }
 0x158   :  { %2288 = vmatprep.subr.bf16.mxu0 %v4376_v50  ;;  %2552 = vmatpush1.bf16.msra.mxu1 %v4425_v19  ;;  %v4430_v50 = vld [vmem:[%s6008_s3 + $0x84] ss:$8 sps:$4 sm:$0xff]  }
 0x159   :  { %2553 = vmatprep.subr.bf16.mxu1 %v4430_v50 }
 0x15b   :  { %2289 = vmatpush1.bf16.msra.mxu0 %v4374_v51  ;;  %v4428_v51 = vld [vmem:[%s6008_s3 + $0x80] ss:$8 sps:$4 sm:$0xff]  }
 0x15c   :  { %2290 = vmatprep.subr.bf16.mxu0 %v4379_v52  ;;  %2554 = vmatpush1.bf16.msra.mxu1 %v4428_v51  ;;  %v4433_v52 = vld [vmem:[%s6008_s3 + $0x94] ss:$8 sps:$4 sm:$0xff]   ;;  %v4443_v51 = vld [vmem:[%s6008_s3 + $0xd0] ss:$8 sps:$4 sm:$0xff]  }
 0x15d   :  { %2555 = vmatprep.subr.bf16.mxu1 %v4433_v52  ;;  %v4448_v52 = vld [vmem:[%s6008_s3 + $0xe4] ss:$8 sps:$4 sm:$0xff]  }
 0x15f   :  { %2291 = vmatpush1.bf16.msra.mxu0 %v4377_v53  ;;  %v4431_v53 = vld [vmem:[%s6008_s3 + $0x90] ss:$8 sps:$4 sm:$0xff]  }
 0x160   :  { %2292 = vmatprep.subr.bf16.mxu0 %v4382_v54  ;;  %2556 = vmatpush1.bf16.msra.mxu1 %v4431_v53  ;;  %v4436_v54 = vld [vmem:[%s6008_s3 + $0xa4] ss:$8 sps:$4 sm:$0xff]   ;;  %v4446_v53 = vld [vmem:[%s6008_s3 + $0xe0] ss:$8 sps:$4 sm:$0xff]  }
 0x161   :  { %2557 = vmatprep.subr.bf16.mxu1 %v4436_v54  ;;  %v4451_v54 = vld [vmem:[%s6008_s3 + $0xf4] ss:$8 sps:$4 sm:$0xff]  }
 0x163   :  { %2293 = vmatpush1.bf16.msra.mxu0 %v4380_v55  ;;  %v4434_v55 = vld [vmem:[%s6008_s3 + $0xa0] ss:$8 sps:$4 sm:$0xff]  }
 0x164   :  { %2294 = vmatprep.subr.bf16.mxu0 %v4385_v56  ;;  %2558 = vmatpush1.bf16.msra.mxu1 %v4434_v55  ;;  %v4439_v56 = vld [vmem:[%s6008_s3 + $0xb4] ss:$8 sps:$4 sm:$0xff]   ;;  %v4449_v55 = vld [vmem:[%s6008_s3 + $0xf0] ss:$8 sps:$4 sm:$0xff]  }
 0x165   :  { %2559 = vmatprep.subr.bf16.mxu1 %v4439_v56  ;;  %v4454_v56 = vld [vmem:[%s6008_s3 + $0x104] ss:$8 sps:$4 sm:$0xff]  }
 0x167   :  { %2295 = vmatpush1.bf16.msra.mxu0 %v4383_v57  ;;  %v4437_v57 = vld [vmem:[%s6008_s3 + $0xb0] ss:$8 sps:$4 sm:$0xff]  }
 0x168   :  { %2296 = vmatprep.subr.bf16.mxu0 %v4388_v58  ;;  %2560 = vmatpush1.bf16.msra.mxu1 %v4437_v57  ;;  %v4442_v58 = vld [vmem:[%s6008_s3 + $0xc4] ss:$8 sps:$4 sm:$0xff]   ;;  %v4452_v57 = vld [vmem:[%s6008_s3 + $0x100] ss:$8 sps:$4 sm:$0xff]  }
 0x169   :  { %2735 = vmatprep.subr.bf16.mxu1 %v4442_v58  ;;  %v4457_v58 = vld [vmem:[%s6008_s3 + $0x114] ss:$8 sps:$4 sm:$0xff]  }
 0x16b   :  { %2297 = vmatpush1.bf16.msra.mxu0 %v4386_v59 }
 0x16c   :  { %2298 = vmatprep.subr.bf16.mxu0 %v4391_v60 }
 0x16f   :  { %2299 = vmatpush1.bf16.msra.mxu0 %v4389_v61 }
 0x170   :  { %2300 = vmatprep.subr.bf16.mxu0 %v4394_v62 }
 0x173   :  { %2301 = vmatpush1.bf16.msra.mxu0 %v4392_v63 }
 0x174   :  { %2302 = vmatprep.subr.bf16.mxu0 %v4397_v0 }
 0x177   :  { %2303 = vmatpush1.bf16.msra.mxu0 %v4395_v1 }
 0x178   :  { %2304 = vmatprep.subr.bf16.mxu0 %v4400_v2 }
 0x17b   :  { %2305 = vmatpush1.bf16.msra.mxu0 %v4398_v3 }
 0x17c   :  { %2306 = vmatprep.subr.bf16.mxu0 %v4403_v4  ;;  %v2358_v4 = vsub.s32 0, %v5576_v8 }
 0x17f   :  { %2307 = vmatpush1.bf16.msra.mxu0 %v4401_v5 }
 0x182   :  { %2309 = vmatmul.mubr.bf16.vlgmr.msra.gmra.mrb[8].mxu0 %v5209_v12 }
 0x183   :  { %2318 = vmatprep.mubr.bf16.mxu0 %v5220_v15 }
 0x18a   :  { %2319 = vmatmul.mubr.bf16.gmra.mrb[12].mxu0 %v5234_v20 }
 0x195   :  { %v918_v10 = vpop.f32.mrb[0].mxu0 }
 0x196   :  { %v920_v11 = vpop.f32.mrb[1].mxu0  ;;  %v937_v16 = vrot.slane %v918_v10, 1 }
 0x197   :  { %v922_v13 = vpop.f32.mrb[2].mxu0  ;;  %v1574_v14 = vpop.f32.mrb[0].mxu1  ;;  %v938_v23 = vrot.slane %v920_v11, 1 }
 0x198   :  { %v939_v18 = vrot.slane %v922_v13, 1  ;;  %v924_v21 = vpop.f32.mrb[3].mxu0  ;;  %v1576_v22 = vpop.f32.mrb[1].mxu1  ;;  %v2362_v13 = vsub.s32 1, %v5576_v8 }
 0x199   :  { %v940_v24 = vrot.slane %v924_v21, 1  ;;  %v1578_v12 = vpop.f32.mrb[2].mxu1 }
 0x19a   :  { %v950_v15 = vsel %vm945_vm0, %v937_v16, %v939_v18  ;;  %v1580_v20 = vpop.f32.mrb[3].mxu1 }
 0x19b   :  { %v3895_v25 = vadd.f32 %v1574_v14, %v950_v15  ;;  %v951_v26 = vsel %vm945_vm0, %v938_v23, %v940_v24  ;;  %v5651_v14 = vadd.s32 8, %v5576_v8 }
 0x19c   :  { %v3896_v27 = vadd.f32 %v1576_v22, %v951_v26 }
 0x19d   :  { %v928_v28 = vpop.f32.mrb[4].mxu0  ;;  %vm44_vm2 = vcmp.lt.s32.totalorder %v5651_v14, 14 }
 0x19e   :  { %v941_v29 = vrot.slane %v928_v28, 1  ;;  %v930_v30 = vpop.f32.mrb[5].mxu0  ;;  %vm5687_vm5 = vmpackc.low %vm44_vm2, %vm4541_vm4 }
 0x19f   :  { %v942_v31 = vrot.slane %v930_v30, 1  ;;  %v932_v32 = vpop.f32.mrb[6].mxu0  ;;  %v1584_v33 = vpop.f32.mrb[4].mxu1 }
 0x1a0   :  { %v948_v34 = vsel %vm945_vm0, %v939_v18, %v941_v29  ;;  %v943_v35 = vrot.slane %v932_v32, 1  ;;  %v934_v36 = vpop.f32.mrb[7].mxu0  ;;  %v1586_v37 = vpop.f32.mrb[5].mxu1  ;;  %v2359_v18 = vrot.slane %v2354_v7, %v2358_v4 }
 0x1a1   :  { %v5585_v38 = vadd.f32 %v1578_v12, %v948_v34  ;;  %v949_v39 = vsel %vm945_vm0, %v940_v24, %v942_v31  ;;  %v944_v40 = vrot.slane %v934_v36, 1  ;;  %v1588_v41 = vpop.f32.mrb[6].mxu1  ;;  %v2363_v12 = vrot.slane %v2354_v7, %v2362_v13  ;;  %v4470_v7 = vld [vmem:[%s6008_s3 + $0x160] ss:$8 sps:$4 sm:$0xff]  }
 0x1a2   :  { %v5589_v42 = vadd.f32 %v1580_v20, %v949_v39  ;;  %v946_v43 = vsel %vm945_vm0, %v941_v29, %v943_v35  ;;  %v952_v44 = vsel %vm945_vm0, %v943_v35, %v937_v16  ;;  %v1590_v45 = vpop.f32.mrb[7].mxu1 }
 0x1a3   :  { %v5595_v46 = vadd.f32 %v1584_v33, %v946_v43  ;;  %v947_v47 = vsel %vm945_vm0, %v942_v31, %v944_v40  ;;  %v5599_v6 = vadd.f32 %v1588_v41, %v952_v44  ;;  %v953_v9 = vsel %vm945_vm0, %v944_v40, %v938_v23 }
 0x1a4   :  { %v5603_v48 = vadd.f32 %v1586_v37, %v947_v47  ;;  %v5605_v49 = vadd.f32 %v1590_v45, %v953_v9  ;;  %v4440_v9 = vld [vmem:[%s6008_s3 + $0xc0] ss:$8 sps:$4 sm:$0xff]  }
 0x255   :  { %v2310_v59 = vpop.f32.mrb[8].mxu0 }
 0x256   :  { %v2312_v60 = vpop.f32.mrb[9].mxu0  ;;  %v2329_v62 = vrot.slane %v2310_v59, 2  ;;  %v4455_v59 = vld [vmem:[%s6008_s3 + $0x110] ss:$8 sps:$4 sm:$0xff]  }
 0x257   :  { %v2314_v61 = vpop.f32.mrb[10].mxu0  ;;  %v2330_v1 = vrot.slane %v2312_v60, 2  ;;  %v4460_v60 = vld [vmem:[%s6008_s3 + $0x124] ss:$8 sps:$4 sm:$0xff]  }
 0x258   :  { %v2331_v63 = vrot.slane %v2314_v61, 2  ;;  %v2316_v0 = vpop.f32.mrb[11].mxu0  ;;  %v4458_v61 = vld [vmem:[%s6008_s3 + $0x120] ss:$8 sps:$4 sm:$0xff]  }
 0x259   :  { %v2332_v2 = vrot.slane %v2316_v0, 2  ;;  %v4466_v0 = vld [vmem:[%s6008_s3 + $0x144] ss:$8 sps:$4 sm:$0xff]  }
 0x25a   :  { %v2342_v3 = vsel %vm2337_vm1, %v2329_v62, %v2331_v63 }
 0x25b   :  { %v2346_v5 = vadd.f32 %v3895_v25, %v2342_v3  ;;  %v2343_v10 = vsel %vm2337_vm1, %v2330_v1, %v2332_v2  ;;  %v4467_v3 = vld [vmem:[%s6008_s3 + $0x150] ss:$8 sps:$4 sm:$0xff]  }
 0x25c   :  { %v2347_v11 = vadd.f32 %v3896_v27, %v2343_v10  ;;  %v4475_v10 = vld [vmem:[%s6008_s3 + $0x174] ss:$8 sps:$4 sm:$0xff]  }
 0x25d   :  { %v2320_v16 = vpop.f32.mrb[12].mxu0  ;;  %v2366_v29 = vadd.f32 %v2359_v18, %v2346_v5  ;;  %v4472_v5 = vld [vmem:[%s6008_s3 + $0x164] ss:$8 sps:$4 sm:$0xff]  }
 0x25e   :  { %v2333_v21 = vrot.slane %v2320_v16, 2  ;;  %v2322_v22 = vpop.f32.mrb[13].mxu0  ;;  %v2367_v37 = vadd.f32 %v2363_v12, %v2347_v11  ;;  %v4473_v11 = vld [vmem:[%s6008_s3 + $0x170] ss:$8 sps:$4 sm:$0xff]   ;;  %v4478_v16 = vld [vmem:[%s6008_s3 + $0x184] ss:$8 sps:$4 sm:$0xff]  }
 0x25f   :  { %v2334_v23 = vrot.slane %v2322_v22, 2  ;;  %v2324_v24 = vpop.f32.mrb[14].mxu0  ;;  %v4479_v22 = vld [vmem:[%s6008_s3 + $0x190] ss:$8 sps:$4 sm:$0xff]  }
 0x260   :  { %v2340_v15 = vsel %vm2337_vm1, %v2331_v63, %v2333_v21  ;;  %v2335_v20 = vrot.slane %v2324_v24, 2  ;;  %v2326_v25 = vpop.f32.mrb[15].mxu0  ;;  %v4461_v63 = vld [vmem:[%s6008_s3 + $0x130] ss:$8 sps:$4 sm:$0xff]   ;;  %v4482_v24 = vld [vmem:[%s6008_s3 + $0x1a0] ss:$8 sps:$4 sm:$0xff]  }
 0x261   :  { %v2348_v26 = vadd.f32 %v5585_v38, %v2340_v15  ;;  %v2341_v27 = vsel %vm2337_vm1, %v2332_v2, %v2334_v23  ;;  %v2336_v28 = vrot.slane %v2326_v25, 2  ;;  %v4469_v2 = vld [vmem:[%s6008_s3 + $0x154] ss:$8 sps:$4 sm:$0xff]   ;;  %v4485_v15 = vld [vmem:[%s6008_s3 + $0x1b0] ss:$8 sps:$4 sm:$0xff]  }
 0x262   :  { %v2349_v30 = vadd.f32 %v5589_v42, %v2341_v27  ;;  %v2338_v31 = vsel %vm2337_vm1, %v2333_v21, %v2335_v20  ;;  %v2344_v32 = vsel %vm2337_vm1, %v2335_v20, %v2329_v62  ;;  %v4463_v62 = vld [vmem:[%s6008_s3 + $0x134] ss:$8 sps:$4 sm:$0xff]   ;;  %v4490_v20 = vld [vmem:[%s6008_s3 + $0x1c4] ss:$8 sps:$4 sm:$0xff]   ;;  %v4488_v25 = vld [vmem:[%s6008_s3 + $0x1c0] ss:$8 sps:$4 sm:$0xff]  }
 0x263   :  { %v2368_v33 = vadd.f32 %v2359_v18, %v2348_v26  ;;  %v2350_v34 = vadd.f32 %v5595_v46, %v2338_v31  ;;  %v2352_v35 = vadd.f32 %v5599_v6, %v2344_v32  ;;  %v2339_v36 = vsel %vm2337_vm1, %v2334_v23, %v2336_v28  ;;  %v4481_v21 = vld [vmem:[%s6008_s3 + $0x194] ss:$8 sps:$4 sm:$0xff]   ;;  %v4484_v23 = vld [vmem:[%s6008_s3 + $0x1a4] ss:$8 sps:$4 sm:$0xff]   ;;  %v4491_v27 = vld [vmem:[%s6008_s3 + $0x1d0] ss:$8 sps:$4 sm:$0xff]  }
 0x264   :  { %v2369_v38 = vadd.f32 %v2363_v12, %v2349_v30  ;;  %v2345_v39 = vsel %vm2337_vm1, %v2336_v28, %v2330_v1  ;;  %v2351_v40 = vadd.f32 %v5603_v48, %v2339_v36  ;;  %v4464_v1 = vld [vmem:[%s6008_s3 + $0x140] ss:$8 sps:$4 sm:$0xff]   ;;  %v4493_v26 = vld [vmem:[%s6008_s3 + $0x1d4] ss:$8 sps:$4 sm:$0xff]   ;;  %v4496_v28 = vld [vmem:[%s6008_s3 + $0x1e4] ss:$8 sps:$4 sm:$0xff]  }
 0x265   :  { %v5675_v41 = vpack.c.bf16 %v2368_v33, %v2366_v29  ;;  %v2370_v42 = vadd.f32 %v2359_v18, %v2350_v34  ;;  %v2372_v43 = vadd.f32 %v2359_v18, %v2352_v35  ;;  %v2353_v44 = vadd.f32 %v5605_v49, %v2345_v39  ;;  %v4476_v18 = vld [vmem:[%s6008_s3 + $0x180] ss:$8 sps:$4 sm:$0xff]   ;;  %v4499_v30 = vld [vmem:[%s6008_s3 + $0x1f4] ss:$8 sps:$4 sm:$0xff]   ;;  %v4497_v31 = vld [vmem:[%s6008_s3 + $0x1f0] ss:$8 sps:$4 sm:$0xff]  }
 0x266   :  { %v2371_v45 = vadd.f32 %v2363_v12, %v2351_v40  ;;  %v2377_v46 = vsel %vm44_vm2, %v2369_v38, 0.0  ;;  %v4494_v29 = vld [vmem:[%s6008_s3 + $0x1e0] ss:$8 sps:$4 sm:$0xff]   ;;  %v4502_v32 = vld [vmem:[%s6008_s3 + $0x204] ss:$8 sps:$4 sm:$0xff]   ;;  %v3101_v48 = vld [vmem:[%s6010_s5 + $0x30] sm:$0xff] }
 0x267   :  { %v2373_v47 = vadd.f32 %v2363_v12, %v2353_v44  ;;  %v5680_v6 = vpack.c.bf16 %v2377_v46, %v2367_v37  ;;  %v5691_v49 = vpack.c.bf16 %v2372_v43, %v2370_v42  ;;  %v4487_v12 = vld [vmem:[%s6008_s3 + $0x1b4] ss:$8 sps:$4 sm:$0xff]   ;;  %v4500_v33 = vld [vmem:[%s6008_s3 + $0x200] ss:$8 sps:$4 sm:$0xff]   ;;  %v4503_v35 = vld [vmem:[%s6008_s3 + $0x210] ss:$8 sps:$4 sm:$0xff]  }
 0x268   :  { %v4505_v34 = vld [vmem:[%s6008_s3 + $0x214] ss:$8 sps:$4 sm:$0xff]   ;;  %v4508_v36 = vld [vmem:[%s6008_s3 + $0x224] ss:$8 sps:$4 sm:$0xff]   ;;  %v4506_v37 = vld [vmem:[%s6008_s3 + $0x220] ss:$8 sps:$4 sm:$0xff]  }
 0x269   :  { %3737 = vmatprep.mubr.msk.bf16.mxu1 %vm2530_vm3, %v5680_v6  ;;  %v2381_v19 = vsel %vm44_vm2, %v2373_v47, 0.0  ;;  %v4511_v38 = vld [vmem:[%s6008_s3 + $0x234] ss:$8 sps:$4 sm:$0xff]   ;;  %v4509_v39 = vld [vmem:[%s6008_s3 + $0x230] ss:$8 sps:$4 sm:$0xff]   ;;  %v3095_v40 = vld [vmem:[%s6010_s5] sm:$0xff] }
 0x26a   :  { %3740 = vmatmul.mubr.msk.bf16.vlgmr.msra.gmra.mrb[8].mxu1 %vm5687_vm5, %v5675_v41  ;;  %v5703_v50 = vpack.c.bf16 %v2381_v19, %v2371_v45  ;;  %v3096_v42 = vld [vmem:[%s6010_s5 + $0x8] sm:$0xff]  ;;  %v3097_v43 = vld [vmem:[%s6010_s5 + $0x10] sm:$0xff]  ;;  %v3098_v45 = vld [vmem:[%s6010_s5 + $0x18] sm:$0xff] }
 0x26b   :  { %2736 = vmatpush1.bf16.msra.mxu1 %v4440_v9  ;;  %v3860_v44 = vpack.c.bf16 %v3096_v42, %v3095_v40  ;;  %v3863_v46 = vpack.c.bf16 %v3098_v45, %v3097_v43  ;;  %v3099_v47 = vld [vmem:[%s6010_s5 + $0x20] sm:$0xff] }
 0x26c   :  { %3741 = vmatprep.mubr.msk.bf16.mxu1 %vm2530_vm3, %v5703_v50  ;;  %2737 = vmatprep.subr.bf16.mxu1 %v4445_v17  ;;  %v3103_v19 = vld [vmem:[%s6010_s5 + $0x40] sm:$0xff] }
 0x26f   :  { %2738 = vmatpush1.bf16.msra.mxu1 %v4443_v51 }
 0x270   :  { %2739 = vmatprep.subr.bf16.mxu1 %v4448_v52  ;;  %v3105_v52 = vld [vmem:[%s6010_s5 + $0x50] sm:$0xff] }
 0x272   :  { %3744 = vmatmul.mubr.msk.bf16.gmra.mrb[12].mxu1 %vm5687_vm5, %v5691_v49 }
 0x273   :  { %2740 = vmatpush1.bf16.msra.mxu1 %v4446_v53  ;;  %3793 = vmatprep.mubr.msk.bf16.mxu1 %vm2530_vm3, %v5680_v6  ;;  %v3106_v53 = vld [vmem:[%s6010_s5 + $0x58] sm:$0xff] }
 0x274   :  { %2741 = vmatprep.subr.bf16.mxu1 %v4451_v54  ;;  %v3875_v54 = vpack.c.bf16 %v3106_v53, %v3105_v52 }
 0x277   :  { %2742 = vmatpush1.bf16.msra.mxu1 %v4449_v55  ;;  %v3107_v55 = vld [vmem:[%s6010_s5 + $0x60] sm:$0xff] }
 0x278   :  { %2743 = vmatprep.subr.bf16.mxu1 %v4454_v56  ;;  %v3108_v56 = vld [vmem:[%s6010_s5 + $0x68] sm:$0xff] }
 0x27b   :  { %2744 = vmatpush1.bf16.msra.mxu1 %v4452_v57  ;;  %v3878_v57 = vpack.c.bf16 %v3108_v56, %v3107_v55 }
 0x27c   :  { %2745 = vmatprep.subr.bf16.mxu1 %v4457_v58  ;;  %v3109_v58 = vld [vmem:[%s6010_s5 + $0x70] sm:$0xff] }
 0x27f   :  { %2746 = vmatpush1.bf16.msra.mxu1 %v4455_v59  ;;  %v3110_v59 = vld [vmem:[%s6010_s5 + $0x78] sm:$0xff] }
 0x280   :  { %2747 = vmatprep.subr.bf16.mxu1 %v4460_v60  ;;  %v3881_v60 = vpack.c.bf16 %v3110_v59, %v3109_v58 }
 0x283   :  { %2748 = vmatpush1.bf16.msra.mxu1 %v4458_v61  ;;  %v3111_v61 = vld [vmem:[%s6010_s5 + $0x80] sm:$0xff] }
 0x284   :  { %2749 = vmatprep.subr.bf16.mxu1 %v4463_v62  ;;  %v3112_v62 = vld [vmem:[%s6010_s5 + $0x88] sm:$0xff] }
 0x287   :  { %2750 = vmatpush1.bf16.msra.mxu1 %v4461_v63  ;;  %v3884_v63 = vpack.c.bf16 %v3112_v62, %v3111_v61 }
 0x288   :  { %2751 = vmatprep.subr.bf16.mxu1 %v4466_v0  ;;  %v3113_v0 = vld [vmem:[%s6010_s5 + $0x90] sm:$0xff] }
 0x28b   :  { %2752 = vmatpush1.bf16.msra.mxu1 %v4464_v1  ;;  %v3114_v1 = vld [vmem:[%s6010_s5 + $0x98] sm:$0xff] }
 0x28c   :  { %2753 = vmatprep.subr.bf16.mxu1 %v4469_v2  ;;  %v3887_v2 = vpack.c.bf16 %v3114_v1, %v3113_v0 }
 0x28f   :  { %2754 = vmatpush1.bf16.msra.mxu1 %v4467_v3  ;;  %v3115_v3 = vld [vmem:[%s6010_s5 + $0xa0] sm:$0xff] }
 0x290   :  { %2755 = vmatprep.subr.bf16.mxu1 %v4472_v5  ;;  %v3116_v5 = vld [vmem:[%s6010_s5 + $0xa8] sm:$0xff] }
 0x293   :  { %2756 = vmatpush1.bf16.msra.mxu1 %v4470_v7  ;;  %v3890_v7 = vpack.c.bf16 %v3116_v5, %v3115_v3 }
 0x294   :  { %2757 = vmatprep.subr.bf16.mxu1 %v4475_v10  ;;  %v3117_v10 = vld [vmem:[%s6010_s5 + $0xb0] sm:$0xff] }
 0x297   :  { %2758 = vmatpush1.bf16.msra.mxu1 %v4473_v11  ;;  %v3118_v11 = vld [vmem:[%s6010_s5 + $0xb8] sm:$0xff] }
 0x298   :  { %2933 = vmatprep.subr.bf16.mxu1 %v4478_v16  ;;  %v3893_v16 = vpack.c.bf16 %v3118_v11, %v3117_v10 }
 0x29a   :  { %3796 = vmatmul.mubr.msk.bf16.vlgmr.msra.gmra.mrb[16].mxu1 %vm5687_vm5, %v5675_v41 }
 0x29b   :  { %3797 = vmatprep.mubr.msk.bf16.mxu1 %vm2530_vm3, %v5703_v50  ;;  %2934 = vmatpush1.bf16.msra.mxu1 %v4476_v18 }
 0x29c   :  { %2935 = vmatprep.subr.bf16.mxu1 %v4481_v21 }
 0x29f   :  { %2936 = vmatpush1.bf16.msra.mxu1 %v4479_v22 }
 0x2a0   :  { %2937 = vmatprep.subr.bf16.mxu1 %v4484_v23 }
 0x2a2   :  { %3800 = vmatmul.mubr.msk.bf16.gmra.mrb[20].mxu1 %vm5687_vm5, %v5691_v49 }
 0x2a3   :  { %2938 = vmatpush1.bf16.msra.mxu1 %v4482_v24  ;;  %3849 = vmatprep.mubr.msk.bf16.mxu1 %vm2530_vm3, %v5680_v6  ;;  %v3100_v6 = vld [vmem:[%s6010_s5 + $0x28] sm:$0xff] }
 0x2a4   :  { %2939 = vmatprep.subr.bf16.mxu1 %v4487_v12  ;;  %v3866_v9 = vpack.c.bf16 %v3100_v6, %v3099_v47 }
 0x2a7   :  { %2940 = vmatpush1.bf16.msra.mxu1 %v4485_v15 }
 0x2a8   :  { %2941 = vmatprep.subr.bf16.mxu1 %v4490_v20 }
 0x2ab   :  { %2942 = vmatpush1.bf16.msra.mxu1 %v4488_v25 }
 0x2ac   :  { %2943 = vmatprep.subr.bf16.mxu1 %v4493_v26 }
 0x2af   :  { %2944 = vmatpush1.bf16.msra.mxu1 %v4491_v27 }
 0x2b0   :  { %2945 = vmatprep.subr.bf16.mxu1 %v4496_v28 }
 0x2b3   :  { %2946 = vmatpush1.bf16.msra.mxu1 %v4494_v29 }
 0x2b4   :  { %2947 = vmatprep.subr.bf16.mxu1 %v4499_v30 }
 0x2b7   :  { %2948 = vmatpush1.bf16.msra.mxu1 %v4497_v31 }
 0x2b8   :  { %2949 = vmatprep.subr.bf16.mxu1 %v4502_v32 }
 0x2bb   :  { %2950 = vmatpush1.bf16.msra.mxu1 %v4500_v33 }
 0x2bc   :  { %2951 = vmatprep.subr.bf16.mxu1 %v4505_v34 }
 0x2bf   :  { %2952 = vmatpush1.bf16.msra.mxu1 %v4503_v35 }
 0x2c0   :  { %2953 = vmatprep.subr.bf16.mxu1 %v4508_v36 }
 0x2c3   :  { %2954 = vmatpush1.bf16.msra.mxu1 %v4506_v37 }
 0x2c4   :  { %2955 = vmatprep.subr.bf16.mxu1 %v4511_v38 }
 0x2c7   :  { %2956 = vmatpush1.bf16.msra.mxu1 %v4509_v39 }
 0x2ca   :  { %3852 = vmatmul.mubr.msk.bf16.vlgmr.msra.gmra.mrb[24].mxu1 %vm5687_vm5, %v5675_v41  ;;  %v4542_v41 = vmov 0.0|0.0  }
 0x2cb   :  { %3853 = vmatprep.mubr.msk.bf16.mxu1 %vm2530_vm3, %v5703_v50  ;;  %3859 = vmatprep.subr.bf16.mxu1 %v4542_v41  ;;  %v3104_v50 = vld [vmem:[%s6010_s5 + $0x48] sm:$0xff] }
 0x2cc   :  { %3861 = vmatpush1.bf16.msra.mxu1 %v3860_v44  ;;  %v3872_v51 = vpack.c.bf16 %v3104_v50, %v3103_v19 }
 0x2cd   :  { %3862 = vmatprep.subr.bf16.mxu1 %v4542_v41 }
 0x2d0   :  { %3864 = vmatpush1.bf16.msra.mxu1 %v3863_v46 }
 0x2d1   :  { %3865 = vmatprep.subr.bf16.mxu1 %v4542_v41 }
 0x2d2   :  { %3856 = vmatmul.mubr.msk.bf16.gmra.mrb[28].mxu1 %vm5687_vm5, %v5691_v49  ;;  %v3102_v49 = vld [vmem:[%s6010_s5 + $0x38] sm:$0xff] }
 0x2d3   :  { %v3869_v17 = vpack.c.bf16 %v3102_v49, %v3101_v48 }
 0x2d4   :  { %3867 = vmatpush1.bf16.msra.mxu1 %v3866_v9 }
 0x2d5   :  { %3868 = vmatprep.subr.bf16.mxu1 %v4542_v41 }
 0x2d8   :  { %3870 = vmatpush1.bf16.msra.mxu1 %v3869_v17 }
 0x2d9   :  { %3871 = vmatprep.subr.bf16.mxu1 %v4542_v41 }
 0x2dc   :  { %3873 = vmatpush1.bf16.msra.mxu1 %v3872_v51 }
 0x2dd   :  { %3874 = vmatprep.subr.bf16.mxu1 %v4542_v41 }
 0x2e0   :  { %3876 = vmatpush1.bf16.msra.mxu1 %v3875_v54 }
 0x2e1   :  { %3877 = vmatprep.subr.bf16.mxu1 %v4542_v41 }
 0x2e4   :  { %3879 = vmatpush1.bf16.msra.mxu1 %v3878_v57 }
 0x2e5   :  { %3880 = vmatprep.subr.bf16.mxu1 %v4542_v41 }
 0x2e8   :  { %3882 = vmatpush1.bf16.msra.mxu1 %v3881_v60 }
 0x2e9   :  { %3883 = vmatprep.subr.bf16.mxu1 %v4542_v41 }
 0x2ec   :  { %3885 = vmatpush1.bf16.msra.mxu1 %v3884_v63  ;;  %v3035_v63 = vld [vmem:[%s6009_s4] sm:$0x3] }
 0x2ed   :  { %3886 = vmatprep.subr.bf16.mxu1 %v4542_v41  ;;  %v3044_v3 = vrot.slane %v3035_v63, %v2362_v13 }
 0x2f0   :  { %3888 = vmatpush1.bf16.msra.mxu1 %v3887_v2 }
 0x2f1   :  { %3889 = vmatprep.subr.bf16.mxu1 %v4542_v41 }
 0x2f4   :  { %3891 = vmatpush1.bf16.msra.mxu1 %v3890_v7 }
 0x2f5   :  { %3892 = vmatprep.subr.bf16.mxu1 %v4542_v41 }
 0x2f8   :  { %3894 = vmatpush1.bf16.msra.mxu1 %v3893_v16  ;;  %v3040_v16 = vrot.slane %v3035_v63, %v2358_v4 }
 0x33d   :  { %v2571_v18 = vpop.f32.mrb[8].mxu1 }
 0x33e   :  { %v2573_v21 = vpop.f32.mrb[9].mxu1  ;;  %v2986_v23 = vrot.slane %v2571_v18, 7 }
 0x33f   :  { %v2575_v22 = vpop.f32.mrb[10].mxu1  ;;  %v2987_v15 = vrot.slane %v2573_v21, 7 }
 0x340   :  { %v2988_v24 = vrot.slane %v2575_v22, 7  ;;  %v2577_v12 = vpop.f32.mrb[11].mxu1 }
 0x341   :  { %v2989_v20 = vrot.slane %v2577_v12, 7 }
 0x342   :  { %v2999_v25 = vsel %vm2994_vm6, %v2986_v23, %v2988_v24 }
 0x343   :  { %v3000_v26 = vsel %vm2994_vm6, %v2987_v15, %v2989_v20 }
 0x345   :  { %v2581_v27 = vpop.f32.mrb[12].mxu1 }
 0x346   :  { %v2990_v28 = vrot.slane %v2581_v27, 7  ;;  %v2583_v29 = vpop.f32.mrb[13].mxu1 }
 0x347   :  { %v2991_v30 = vrot.slane %v2583_v29, 7  ;;  %v2585_v31 = vpop.f32.mrb[14].mxu1 }
 0x348   :  { %v2992_v32 = vrot.slane %v2585_v31, 7  ;;  %v2587_v33 = vpop.f32.mrb[15].mxu1  ;;  %v2997_v34 = vsel %vm2994_vm6, %v2988_v24, %v2990_v28 }
 0x349   :  { %v2993_v35 = vrot.slane %v2587_v33, 7  ;;  %v2998_v36 = vsel %vm2994_vm6, %v2989_v20, %v2991_v30 }
 0x34a   :  { %v3001_v37 = vsel %vm2994_vm6, %v2992_v32, %v2986_v23  ;;  %v2995_v38 = vsel %vm2994_vm6, %v2990_v28, %v2992_v32 }
 0x34b   :  { %v3002_v39 = vsel %vm2994_vm6, %v2993_v35, %v2987_v15  ;;  %v2996_v40 = vsel %vm2994_vm6, %v2991_v30, %v2993_v35 }
 0x36d   :  { %v2769_v42 = vpop.f32.mrb[16].mxu1 }
 0x36e   :  { %v3003_v43 = vadd.f32 %v3001_v37, %v2769_v42  ;;  %v2771_v41 = vpop.f32.mrb[17].mxu1 }
 0x36f   :  { %v3004_v44 = vadd.f32 %v3002_v39, %v2771_v41  ;;  %v2773_v45 = vpop.f32.mrb[18].mxu1 }
 0x370   :  { %v3005_v46 = vadd.f32 %v2999_v25, %v2773_v45  ;;  %v2775_v47 = vpop.f32.mrb[19].mxu1 }
 0x371   :  { %v3006_v6 = vadd.f32 %v3000_v26, %v2775_v47 }
 0x375   :  { %v2779_v9 = vpop.f32.mrb[20].mxu1 }
 0x376   :  { %v3007_v48 = vadd.f32 %v2997_v34, %v2779_v9  ;;  %v2781_v49 = vpop.f32.mrb[21].mxu1 }
 0x377   :  { %v3008_v17 = vadd.f32 %v2998_v36, %v2781_v49  ;;  %v2783_v19 = vpop.f32.mrb[22].mxu1 }
 0x378   :  { %v3009_v50 = vadd.f32 %v2995_v38, %v2783_v19  ;;  %v2785_v51 = vpop.f32.mrb[23].mxu1 }
 0x379   :  { %v3010_v52 = vadd.f32 %v2996_v40, %v2785_v51 }
 0x39d   :  { %v2967_v53 = vpop.f32.mrb[24].mxu1 }
 0x39e   :  { %v2969_v54 = vpop.f32.mrb[25].mxu1  ;;  %v3011_v56 = vrot.slane %v2967_v53, 1 }
 0x39f   :  { %v2971_v55 = vpop.f32.mrb[26].mxu1  ;;  %v3012_v59 = vrot.slane %v2969_v54, 1 }
 0x3a0   :  { %v3013_v57 = vrot.slane %v2971_v55, 1  ;;  %v2973_v58 = vpop.f32.mrb[27].mxu1 }
 0x3a1   :  { %v3014_v60 = vrot.slane %v2973_v58, 1 }
 0x3a2   :  { %v3023_v61 = vsel %vm945_vm0, %v3011_v56, %v3013_v57 }
 0x3a3   :  { %v3027_v62 = vadd.f32 %v3023_v61, %v3003_v43  ;;  %v3024_v0 = vsel %vm945_vm0, %v3012_v59, %v3014_v60 }
 0x3a4   :  { %v3028_v1 = vadd.f32 %v3024_v0, %v3004_v44 }
 0x3a5   :  { %v2977_v2 = vpop.f32.mrb[28].mxu1  ;;  %v3047_v29 = vadd.f32 %v3040_v16, %v3027_v62 }
 0x3a6   :  { %v3015_v5 = vrot.slane %v2977_v2, 1  ;;  %v2979_v7 = vpop.f32.mrb[29].mxu1  ;;  %v3048_v15 = vadd.f32 %v3044_v3, %v3028_v1 }
 0x3a7   :  { %v3016_v10 = vrot.slane %v2979_v7, 1  ;;  %v2981_v11 = vpop.f32.mrb[30].mxu1 }
 0x3a8   :  { %v3021_v18 = vsel %vm945_vm0, %v3013_v57, %v3015_v5  ;;  %v3017_v21 = vrot.slane %v2981_v11, 1  ;;  %v2983_v22 = vpop.f32.mrb[31].mxu1  ;;  %v3070_v40 = vsel %vm2530_vm3, %v3048_v15, -inf }
 0x3a9   :  { %v3029_v23 = vadd.f32 %v3021_v18, %v3005_v46  ;;  %v3022_v24 = vsel %vm945_vm0, %v3014_v60, %v3016_v10  ;;  %v3018_v12 = vrot.slane %v2983_v22, 1 }
 0x3aa   :  { %v3030_v20 = vadd.f32 %v3022_v24, %v3006_v6  ;;  %v3019_v13 = vsel %vm945_vm0, %v3015_v5, %v3017_v21  ;;  %v3025_v25 = vsel %vm945_vm0, %v3017_v21, %v3011_v56 }
 0x3ab   :  { %v3049_v26 = vadd.f32 %v3040_v16, %v3029_v23  ;;  %v3031_v4 = vadd.f32 %v3019_v13, %v3007_v48  ;;  %v3033_v27 = vadd.f32 %v3025_v25, %v3009_v50  ;;  %v3020_v28 = vsel %vm945_vm0, %v3016_v10, %v3018_v12  ;;  %v3857_v10 = vld [vmem:[%s6011_s6] ss:$0 sm:$0xff] }
 0x3ac   :  { %v3050_v30 = vadd.f32 %v3044_v3, %v3030_v20  ;;  %v3026_v31 = vsel %vm945_vm0, %v3018_v12, %v3012_v59  ;;  %v3032_v32 = vadd.f32 %v3020_v28, %v3008_v17 }
 0x3ad   :  { %v3057_v33 = vsel %vm44_vm2, %v3049_v26, -1e+30  ;;  %v3051_v34 = vadd.f32 %v3040_v16, %v3031_v4  ;;  %v3053_v35 = vadd.f32 %v3040_v16, %v3033_v27  ;;  %v3034_v36 = vadd.f32 %v3026_v31, %v3010_v52 }
 0x3ae   :  { %v3063_v37 = vmax.f32 %v3047_v29, %v3057_v33  ;;  %v3058_v38 = vsel %vm44_vm2, %v3050_v30, -1e+30  ;;  %v3052_v39 = vadd.f32 %v3044_v3, %v3032_v32 }
 0x3af   :  { %v3071_v42 = vsel %vm2530_vm3, %v3058_v38, -inf  ;;  %v3061_v8 = vsel %vm44_vm2, %v3053_v35, -1e+30  ;;  %v3054_v43 = vadd.f32 %v3044_v3, %v3034_v36 }
 0x3b0   :  { %v3064_v41 = vrot.slane %v3063_v37, 4  ;;  %v3072_v44 = vmax.f32 %v3070_v40, %v3071_v42  ;;  %v3079_v45 = vmax.f32 %v3051_v34, %v3061_v8  ;;  %v3086_v46 = vsel %vm2530_vm3, %v3052_v39, -inf }
 0x3b1   :  { %v3062_v47 = vsel %vm44_vm2, %v3054_v43, -1e+30 }
 0x3b2   :  { %v3065_v6 = vmax.f32 %v3063_v37, %v3064_v41  ;;  %v3080_v9 = vrot.slane %v3079_v45, 4  ;;  %v3087_v48 = vsel %vm2530_vm3, %v3062_v47, -inf  ;;  %v3073_v49 = vrot.slane %v3072_v44, 4 }
 0x3b3   :  { %v3088_v17 = vmax.f32 %v3086_v46, %v3087_v48 }
 0x3b4   :  { %v3081_v19 = vmax.f32 %v3079_v45, %v3080_v9  ;;  %v3074_v50 = vmax.f32 %v3072_v44, %v3073_v49  ;;  %v3066_v51 = vrot.slane %v3065_v6, 2 }
 0x3b5   :  { %v3089_v52 = vrot.slane %v3088_v17, 4 }
 0x3b6   :  { %v3082_v53 = vrot.slane %v3081_v19, 2  ;;  %v3075_v54 = vrot.slane %v3074_v50, 2  ;;  %v3067_v55 = vmax.f32 %v3065_v6, %v3066_v51 }
 0x3b7   :  { %v3090_v56 = vmax.f32 %v3088_v17, %v3089_v52 }
 0x3b8   :  { %v3076_v57 = vmax.f32 %v3074_v50, %v3075_v54  ;;  %v3068_v58 = vrot.slane %v3067_v55, 1  ;;  %v3083_v59 = vmax.f32 %v3081_v19, %v3082_v53 }
 0x3b9   :  { %v3091_v60 = vrot.slane %v3090_v56, 2 }
 0x3ba   :  { %v3084_v14 = vrot.slane %v3083_v59, 1  ;;  %v3077_v61 = vrot.slane %v3076_v57, 1  ;;  %v3069_v63 = vmax.f32 %v3067_v55, %v3068_v58 }
 0x3bb   :  { %v3092_v62 = vmax.f32 %v3090_v56, %v3091_v60 }
 0x3bc   :  { %v3085_v0 = vmax.f32 %v3083_v59, %v3084_v14  ;;  %v3078_v3 = vmax.f32 %v3076_v57, %v3077_v61 }
 0x3bd   :  { %v3093_v1 = vrot.slane %v3092_v62, 1 }
 0x3be   :  { %v3131_v2 = vsel %vm3130_vm7, %v3085_v0, %v3069_v63 }
 0x3bf   :  { %v3094_v5 = vmax.f32 %v3092_v62, %v3093_v1 }
 0x3c1   :  { %v3132_v7 = vsel %vm3130_vm7, %v3094_v5, %v3078_v3 }
 0x3c2   :  { %3858 = vmatprep.mubr.msk.f32.mxu1 %vm2530_vm3, %v3132_v7 }
 0x3c3   :  { %3201 = vmatmul.mubr.f32.vlgmr.msra.gmra.mrb[32].mxu1 %v3131_v2 }
 0x496   :  { %v3202_v11 = vpop.f32.mrb[32].mxu1 }
 0x497   :  { %v3203_v16 = vadd.f32 %v3857_v10, %v3202_v11  ;;  %v3204_v18 = vpop.f32.mrb[33].mxu1 }
 0x499   :  { %3206 = vst [vmem:[#allocation2] sm:$0x3] %v3203_v16 }
 0x49a   :  { %4528 = shalt.err (!%p4525_p4)
}
 0x49b   :  { %s4529_s25 = scalar_lea.hbm %s6012_s7, 32 }
 0x49c   :  { %p4530_p5 = scmp.ne.s32.totalorder %s6012_s7, %s4529_s25  ;;  %p4533_p6 = scmp.lt.u32.totalorder %s4529_s25, %s6012_s7 }
 0x49e   :  { %p4535_p7 = pnand %p4533_p6, %p4530_p5 }
 0x4a0   :  { %4538 = shalt.err (!%p4535_p7)
}
 0x4a1   :  { %3216 = dma.vmem_to_hbm [thread:$0]  %s3214_s22, 32, %s6012_s7, [#allocation3]  }
 0x4a2   :  { %4539 = dma.done.wait [#allocation3], 32  }
 0x4a3   :  { %4540 = vsyncadd [#allocation3], 4294967264 }
 0x4a4   :  { %3220 = vsyncpa [#allocation3], 1 }

</bundles_post_ra>
